<compile_context>
chip_gen: v6e
topology: v6e:2x2x1
jax: 0.10.0
libtpu: 0.0.40
codegen_flags: <defaults>
</compile_context>

<pallas_src>
import functools

import jax
import jax.numpy as jnp
from jax.experimental import pallas as pl
from jax.experimental.pallas import tpu as pltpu

_LANE = 128
_SUBLANE = 8


def _round_up(n, m):
    return ((n + m - 1) // m) * m


def _device_kind():
    try:
        return jax.devices()[0].device_kind.lower()
    except Exception:
        return ""


def _num_tensorcores():
    # v7x has 2 TensorCores per chip; v5e/v6e (and unknown) have 1.
    return 2 if "v7" in _device_kind() else 1


def _has_bf16_vpu():
    # v5e has no bf16 VPU -> keep the ReLU/bias path in f32 there.
    return "v5" not in _device_kind()


# -----------------------------------------------------------------------------
# Kernel: fused 3-layer MLP. x arrives unpadded f32 and is cast to bf16 on the
# VPU right before the first MXU dot. All dots accumulate in f32
# (preferred_element_type); bias adds stay in f32 (exact); ReLU runs in
# `act_dtype` (bf16 on v6e/v7x, f32 on v5e).
# -----------------------------------------------------------------------------
def _mlp_kernel(x_ref, w1_ref, b1_ref, w2_ref, b2_ref, w3_ref, b3_ref, o_ref,
                *, act_dtype):
    x = x_ref[...].astype(w1_ref.dtype)
    h = jnp.dot(x, w1_ref[...], preferred_element_type=jnp.float32)
    h = jnp.maximum((h + b1_ref[...]).astype(act_dtype), 0).astype(w2_ref.dtype)
    h = jnp.dot(h, w2_ref[...], preferred_element_type=jnp.float32)
    h = jnp.maximum((h + b2_ref[...]).astype(act_dtype), 0).astype(w3_ref.dtype)
    out = jnp.dot(h, w3_ref[...], preferred_element_type=jnp.float32)
    o_ref[...] = (out + b3_ref[...]).astype(o_ref.dtype)


def prepare_params(params, *, use_bf16=True):
    """One-time padding/casting of the MLP weights (hoisted out of forward()).

    Hidden dims are zero-padded to multiples of 128 so intermediate
    activations are lane-dense; W2/W3 contraction dims are padded to match
    (zero rows -> math is exact). The input dim of W1 and the output dim of W3
    stay at their true widths: full-array BlockSpecs are legal, and for
    nf_out=16 masked stores are cheaper than an 8x-padded writeback + slice.
    """
    w_dtype = jnp.bfloat16 if use_bf16 else jnp.float32
    w1, b1 = params["w1"], params["b1"]
    w2, b2 = params["w2"], params["b2"]
    w3, b3 = params["w3"], params["b3"]
    h0, h1 = w1.shape[1], w2.shape[1]
    h0_p = _round_up(h0, _LANE)
    h1_p = _round_up(h1, _LANE)
    w1p = jnp.pad(w1, ((0, 0), (0, h0_p - h0))).astype(w_dtype)
    w2p = jnp.pad(w2, ((0, h0_p - h0), (0, h1_p - h1))).astype(w_dtype)
    w3p = jnp.pad(w3, ((0, h1_p - h1), (0, 0))).astype(w_dtype)
    b1p = jnp.pad(b1, ((0, 0), (0, h0_p - h0))).astype(jnp.float32)
    b2p = jnp.pad(b2, ((0, 0), (0, h1_p - h1))).astype(jnp.float32)
    b3p = b3.astype(jnp.float32)
    return (w1p, b1p, w2p, b2p, w3p, b3p)


def _choose_batch_tile(B, row_align, num_tc):
    if num_tc <= 1:
        # v5e / v6e: single TensorCore. One grid step (per-step overhead
        # dominates a ~1us kernel); buffers are far below VMEM at these sizes.
        if B <= 4096:
            return _round_up(B, row_align)
        return 512
    # v7x: 2 TensorCores. Aim for 4 grid steps (2 per core) so both cores
    # engage and the x-tile DMA overlaps compute.
    tb = _round_up(max(1, (B + 3) // 4), row_align)
    return max(row_align, tb)


def node_predictor_forward(x, prepared_params):
    """x: (B, nf_in) float32. prepared_params: output of prepare_params()."""
    w1p, b1p, w2p, b2p, w3p, b3p = prepared_params
    B, nf_in = x.shape
    assert w1p.shape[0] == nf_in
    h0_p, h1_p, nf_out = w1p.shape[1], w2p.shape[1], w3p.shape[1]

    use_bf16 = (w1p.dtype == jnp.bfloat16)
    row_align = 16 if use_bf16 else _SUBLANE   # bf16 packs 16 rows / sublane grp
    num_tc = _num_tensorcores()
    tb = _choose_batch_tile(B, row_align, num_tc)
    Bp = _round_up(B, tb)
    grid = (Bp // tb,)

    # Only pad the batch when the tile doesn't divide it (default shapes: no-op).
    xp = x if Bp == B else jnp.pad(x, ((0, Bp - B), (0, 0)))

    act_dtype = jnp.bfloat16 if (use_bf16 and _has_bf16_vpu()) else jnp.float32
    kernel = functools.partial(_mlp_kernel, act_dtype=act_dtype)

    # Tight VMEM budget: double-buffered tiles with lane-layout padding plus
    # ~2 MiB headroom (don't starve neighbouring fusions on v7x's 64 MiB).
    w_isz = jnp.dtype(w1p.dtype).itemsize
    lane = lambda n: _round_up(n, _LANE)
    tile_bytes = (
        tb * lane(nf_in) * 4                              # x tile (f32)
        + tb * lane(nf_out) * 4                           # out tile (f32)
        + (nf_in * lane(h0_p) + h0_p * lane(h1_p) + h1_p * lane(nf_out)) * w_isz
        + (lane(h0_p) + lane(h1_p) + lane(nf_out)) * _SUBLANE * 4
    )
    vmem_limit = int(min(2 * tile_bytes + (2 << 20), 30 << 20))

    flops = 2 * Bp * (nf_in * h0_p + h0_p * h1_p + h1_p * nf_out)
    bytes_accessed = int(
        xp.size * 4
        + (w1p.size + w2p.size + w3p.size) * w_isz
        + (b1p.size + b2p.size + b3p.size) * 4
        + Bp * nf_out * 4
    )

    out = pl.pallas_call(
        kernel,
        out_shape=jax.ShapeDtypeStruct((Bp, nf_out), jnp.float32),
        grid=grid,
        in_specs=[
            pl.BlockSpec((tb, nf_in), lambda i: (i, 0)),     # x (true width)
            pl.BlockSpec((nf_in, h0_p), lambda i: (0, 0)),   # W1
            pl.BlockSpec((1, h0_p), lambda i: (0, 0)),       # b1
            pl.BlockSpec((h0_p, h1_p), lambda i: (0, 0)),    # W2
            pl.BlockSpec((1, h1_p), lambda i: (0, 0)),       # b2
            pl.BlockSpec((h1_p, nf_out), lambda i: (0, 0)),  # W3
            pl.BlockSpec((1, nf_out), lambda i: (0, 0)),     # b3
        ],
        out_specs=pl.BlockSpec((tb, nf_out), lambda i: (i, 0)),  # true width
        compiler_params=pltpu.CompilerParams(
            dimension_semantics=("parallel",),
            vmem_limit_bytes=vmem_limit,
        ),
        cost_estimate=pl.CostEstimate(
            flops=int(flops), transcendentals=0, bytes_accessed=bytes_accessed),
    )(xp, w1p, b1p, w2p, b2p, w3p, b3p)

    if Bp != B:
        out = out[:B]
    return out.astype(x.dtype)


def init_params(key, nf_in, nf_out, hiddens):
    """Deterministic synthetic parameters (Linear layers of the Mlp)."""
    dims = [nf_in] + list(hiddens) + [nf_out]
    params = {}
    keys = jax.random.split(key, len(dims) - 1)
    for li, (din, dout) in enumerate(zip(dims[:-1], dims[1:]), start=1):
        kw, kb = jax.random.split(keys[li - 1])
        bound = 1.0 / jnp.sqrt(din)  # matches torch.nn.Linear default init range
        params[f"w{li}"] = jax.random.uniform(
            kw, (din, dout), jnp.float32, minval=-bound, maxval=bound)
        params[f"b{li}"] = jax.random.uniform(
            kb, (1, dout), jnp.float32, minval=-bound, maxval=bound)
    return params


def _reference_forward_f32(x, params):
    h = jnp.maximum(x @ params["w1"] + params["b1"], 0.0)
    h = jnp.maximum(h @ params["w2"] + params["b2"], 0.0)
    return h @ params["w3"] + params["b3"]


def _reference_forward_bf16(x, params):
    bf = jnp.bfloat16
    h = jnp.dot(x.astype(bf), params["w1"].astype(bf),
                preferred_element_type=jnp.float32) + params["b1"]
    h = jnp.maximum(h, 0.0)
    h = jnp.dot(h.astype(bf), params["w2"].astype(bf),
                preferred_element_type=jnp.float32) + params["b2"]
    h = jnp.maximum(h, 0.0)
    return jnp.dot(h.astype(bf), params["w3"].astype(bf),
                   preferred_element_type=jnp.float32) + params["b3"]


if __name__ == "__main__":
    # Shapes consistent with NodePredictor(nf_in, nf_out, hiddens, n_gaussian).
    nf_in, nf_out = 32, 16
    hiddens = (64, 32)
    n_gaussian = 4   # only affects pmf(), not forward()
    batch = 512

    key = jax.random.PRNGKey(0)
    k_x, k_p = jax.random.split(key)
    x = jax.random.normal(k_x, (batch, nf_in), jnp.float32)
    params = init_params(k_p, nf_in, nf_out, hiddens)

    # One-time parameter preparation (padding/casting hoisted out of forward).
    prepared = jax.block_until_ready(prepare_params(params, use_bf16=True))

    fwd = jax.jit(node_predictor_forward)
    out = jax.block_until_ready(fwd(x, prepared))

    assert out.shape == (batch, nf_out)
    # Tight check against a reference using the same bf16-input / f32-accum math.
    ref_bf16 = _reference_forward_bf16(x, params)
    assert jnp.allclose(out, ref_bf16, atol=1e-2, rtol=1e-2), \
        float(jnp.max(jnp.abs(out - ref_bf16)))
    # Looser check against the full-f32 reference (bf16 weight/activation cast).
    ref_f32 = _reference_forward_f32(x, params)
    assert jnp.allclose(out, ref_f32, atol=5e-2, rtol=5e-2), \
        float(jnp.max(jnp.abs(out - ref_f32)))

    # TODO(synk): `pmf()` (mixture-of-Gaussians binned PMF via erf/logsumexp) is
    # not part of forward() and is not implemented as a kernel here.
    print("KERNEL_OK")
</pallas_src>

<mosaic_0001>
module attributes {stable_mosaic.version = 11 : i64} {
  func.func @_mlp_kernel(%arg0: i32, %arg1: memref<512x32xf32, #tpu.memory_space<vmem>>, %arg2: memref<32x128xbf16, #tpu.memory_space<vmem>>, %arg3: memref<1x128xf32, #tpu.memory_space<vmem>>, %arg4: memref<128x128xbf16, #tpu.memory_space<vmem>>, %arg5: memref<1x128xf32, #tpu.memory_space<vmem>>, %arg6: memref<128x16xbf16, #tpu.memory_space<vmem>>, %arg7: memref<1x16xf32, #tpu.memory_space<vmem>>, %arg8: memref<512x16xf32, #tpu.memory_space<vmem>>) attributes {dimension_semantics = [#tpu.dimension_semantics<parallel>], iteration_bounds = array<i64: 1>, scalar_prefetch = 0 : i64, scratch_operands = 0 : i64, tpu.core_type = #tpu.core_type<tc>, window_params = [{transform_indices = @transform_0, window_bounds = array<i64: 512, 32>}, {pipeline_mode = #tpu.pipeline_mode<synchronous>, transform_indices = @transform_1, window_bounds = array<i64: 32, 128>}, {pipeline_mode = #tpu.pipeline_mode<synchronous>, transform_indices = @transform_2, window_bounds = array<i64: 1, 128>}, {pipeline_mode = #tpu.pipeline_mode<synchronous>, transform_indices = @transform_3, window_bounds = array<i64: 128, 128>}, {pipeline_mode = #tpu.pipeline_mode<synchronous>, transform_indices = @transform_4, window_bounds = array<i64: 1, 128>}, {pipeline_mode = #tpu.pipeline_mode<synchronous>, transform_indices = @transform_5, window_bounds = array<i64: 128, 16>}, {pipeline_mode = #tpu.pipeline_mode<synchronous>, transform_indices = @transform_6, window_bounds = array<i64: 1, 16>}, {transform_indices = @transform_7, window_bounds = array<i64: 512, 16>}]} {
    %c0 = arith.constant 0 : index
    %c0_0 = arith.constant 0 : index
    %0 = vector.load %arg1[%c0, %c0_0] : memref<512x32xf32, #tpu.memory_space<vmem>>, vector<512x32xf32>
    %1 = arith.truncf %0 : vector<512x32xf32> to vector<512x32xbf16>
    %c0_1 = arith.constant 0 : index
    %c0_2 = arith.constant 0 : index
    %2 = vector.load %arg2[%c0_1, %c0_2] : memref<32x128xbf16, #tpu.memory_space<vmem>>, vector<32x128xbf16>
    %cst = arith.constant dense<0.000000e+00> : vector<512x128xf32>
    %3 = tpu.matmul %1, %2, %cst {dimension_numbers = #tpu.dot_dimension_numbers<[1], [0], [0], [1], [0, 0, 1, 1], [], []>} : vector<512x32xbf16>, vector<32x128xbf16>, vector<512x128xf32> -> vector<512x128xf32>
    %c0_3 = arith.constant 0 : index
    %c0_4 = arith.constant 0 : index
    %4 = vector.load %arg3[%c0_3, %c0_4] : memref<1x128xf32, #tpu.memory_space<vmem>>, vector<1x128xf32>
    %5 = vector.broadcast %4 : vector<1x128xf32> to vector<512x128xf32>
    %6 = arith.addf %3, %5 : vector<512x128xf32>
    %7 = arith.truncf %6 : vector<512x128xf32> to vector<512x128xbf16>
    %cst_5 = arith.constant 0.000000e+00 : bf16
    %8 = vector.broadcast %cst_5 : bf16 to vector<512x128xbf16>
    %9 = arith.maximumf %7, %8 : vector<512x128xbf16>
    %c0_6 = arith.constant 0 : index
    %c0_7 = arith.constant 0 : index
    %10 = vector.load %arg4[%c0_6, %c0_7] : memref<128x128xbf16, #tpu.memory_space<vmem>>, vector<128x128xbf16>
    %cst_8 = arith.constant dense<0.000000e+00> : vector<512x128xf32>
    %11 = tpu.matmul %9, %10, %cst_8 {dimension_numbers = #tpu.dot_dimension_numbers<[1], [0], [0], [1], [0, 0, 1, 1], [], []>} : vector<512x128xbf16>, vector<128x128xbf16>, vector<512x128xf32> -> vector<512x128xf32>
    %c0_9 = arith.constant 0 : index
    %c0_10 = arith.constant 0 : index
    %12 = vector.load %arg5[%c0_9, %c0_10] : memref<1x128xf32, #tpu.memory_space<vmem>>, vector<1x128xf32>
    %13 = vector.broadcast %12 : vector<1x128xf32> to vector<512x128xf32>
    %14 = arith.addf %11, %13 : vector<512x128xf32>
    %15 = arith.truncf %14 : vector<512x128xf32> to vector<512x128xbf16>
    %cst_11 = arith.constant 0.000000e+00 : bf16
    %16 = vector.broadcast %cst_11 : bf16 to vector<512x128xbf16>
    %17 = arith.maximumf %15, %16 : vector<512x128xbf16>
    %c0_12 = arith.constant 0 : index
    %c0_13 = arith.constant 0 : index
    %18 = vector.load %arg6[%c0_12, %c0_13] : memref<128x16xbf16, #tpu.memory_space<vmem>>, vector<128x16xbf16>
    %cst_14 = arith.constant dense<0.000000e+00> : vector<512x16xf32>
    %19 = tpu.matmul %17, %18, %cst_14 {dimension_numbers = #tpu.dot_dimension_numbers<[1], [0], [0], [1], [0, 0, 1, 1], [], []>} : vector<512x128xbf16>, vector<128x16xbf16>, vector<512x16xf32> -> vector<512x16xf32>
    %c0_15 = arith.constant 0 : index
    %c0_16 = arith.constant 0 : index
    %20 = vector.load %arg7[%c0_15, %c0_16] : memref<1x16xf32, #tpu.memory_space<vmem>>, vector<1x16xf32>
    %21 = vector.broadcast %20 : vector<1x16xf32> to vector<512x16xf32>
    %22 = arith.addf %19, %21 : vector<512x16xf32>
    %c0_17 = arith.constant 0 : index
    %c0_18 = arith.constant 0 : index
    %23 = vector.load %arg8[%c0_17, %c0_18] : memref<512x16xf32, #tpu.memory_space<vmem>>, vector<512x16xf32>
    tpu.vector_store %arg8[%c0_17, %c0_18], %22 {strides = array<i32>} : memref<512x16xf32, #tpu.memory_space<vmem>>, vector<512x16xf32>,
    return
  }
  func.func @transform_0(%arg0: i32) -> (i32, i32) {
    %c0_i32 = arith.constant 0 : i32
    %c0_i32_0 = arith.constant 0 : i32
    return %arg0, %c0_i32 : i32, i32
  }
  func.func @transform_1(%arg0: i32) -> (i32, i32) {
    %c0_i32 = arith.constant 0 : i32
    %c0_i32_0 = arith.constant 0 : i32
    %c0_i32_1 = arith.constant 0 : i32
    return %c0_i32, %c0_i32_0 : i32, i32
  }
  func.func @transform_2(%arg0: i32) -> (i32, i32) {
    %c0_i32 = arith.constant 0 : i32
    %c0_i32_0 = arith.constant 0 : i32
    %c0_i32_1 = arith.constant 0 : i32
    return %c0_i32, %c0_i32_0 : i32, i32
  }
  func.func @transform_3(%arg0: i32) -> (i32, i32) {
    %c0_i32 = arith.constant 0 : i32
    %c0_i32_0 = arith.constant 0 : i32
    %c0_i32_1 = arith.constant 0 : i32
    return %c0_i32, %c0_i32_0 : i32, i32
  }
  func.func @transform_4(%arg0: i32) -> (i32, i32) {
    %c0_i32 = arith.constant 0 : i32
    %c0_i32_0 = arith.constant 0 : i32
    %c0_i32_1 = arith.constant 0 : i32
    return %c0_i32, %c0_i32_0 : i32, i32
  }
  func.func @transform_5(%arg0: i32) -> (i32, i32) {
    %c0_i32 = arith.constant 0 : i32
    %c0_i32_0 = arith.constant 0 : i32
    %c0_i32_1 = arith.constant 0 : i32
    return %c0_i32, %c0_i32_0 : i32, i32
  }
  func.func @transform_6(%arg0: i32) -> (i32, i32) {
    %c0_i32 = arith.constant 0 : i32
    %c0_i32_0 = arith.constant 0 : i32
    %c0_i32_1 = arith.constant 0 : i32
    return %c0_i32, %c0_i32_0 : i32, i32
  }
  func.func @transform_7(%arg0: i32) -> (i32, i32) {
    %c0_i32 = arith.constant 0 : i32
    %c0_i32_0 = arith.constant 0 : i32
    return %arg0, %c0_i32 : i32, i32
  }
}

</mosaic_0001>

<bundles_post_ra>
// kernel: node_predictor_forward.1
= control target key start
LH: loop header
LB: loop body
LE: loop exit
PB: predicated region body
PF: predicated region fallthrough
CT: control target
= control target key end

     0   :  { %vm146_vm0 = vcmask 261120   ;;  %vm1380_vm1 = vcmask 130048   ;;  %s2767_s1 = inlined_call_operand.vmem [shape: bf16[32,128], index: 1, kind: input, shape index: {}]   ;;  %s2768_s0 = inlined_call_operand.vmem [shape: f32[512,32], index: 0, kind: input, shape index: {}]   ;;  %s2769_s3 = inlined_call_operand.vmem [shape: bf16[128,128], index: 3, kind: input, shape index: {}]   ;;  %s2770_s2 = inlined_call_operand.vmem [shape: f32[1,128], index: 2, kind: input, shape index: {}]   ;;  %s2771_s5 = inlined_call_operand.vmem [shape: bf16[128,16], index: 5, kind: input, shape index: {}]   ;;  %s2772_s4 = inlined_call_operand.vmem [shape: f32[1,128], index: 4, kind: input, shape index: {}]   ;;  %s2773_s6 = inlined_call_operand.vmem [shape: f32[1,16], index: 6, kind: input, shape index: {}]   ;;  %s2774_s7 = inlined_call_operand.vmem [shape: f32[512,16], index: 7, kind: output, shape index: {}]  }
   0x1   :  { %v1849_v0 = vld [vmem:[%s2767_s1 + $0x8] sm:$0xff]   ;;  %v1850_v1 = vld [vmem:[%s2767_s1] sm:$0xff]   ;;  %v29_v5 = vld [vmem:[%s2768_s0 + $0x10] sm:$0xff] }
   0x2   :  { %1616 = vmatprep.subr.bf16.mxu0 %v1849_v0  ;;  %v27_v2 = vld [vmem:[%s2768_s0] sm:$0xff]  ;;  %v28_v3 = vld [vmem:[%s2768_s0 + $0x8] sm:$0xff]  ;;  %1844 = vmatprep.subr.bf16.mxu1 %v1849_v0  ;;  %v30_v6 = vld [vmem:[%s2768_s0 + $0x18] sm:$0xff] }
   0x3   :  { %1617 = vmatpush3.bf16.msra.mxu0 %v1849_v0  ;;  %v91_v4 = vpack.c.bf16 %v28_v3, %v27_v2  ;;  %1846 = vmatpush3.bf16.msra.mxu1 %v1849_v0  ;;  %v31_v7 = vld [vmem:[%s2768_s0 + $0x20] sm:$0xff]  ;;  %v32_v8 = vld [vmem:[%s2768_s0 + $0x28] sm:$0xff]  ;;  %v92_v9 = vpack.c.bf16 %v30_v6, %v29_v5  ;;  %v33_v11 = vld [vmem:[%s2768_s0 + $0x30] sm:$0xff] }
   0x4   :  { %1618 = vmatprep.subr.bf16.mxu0 %v1850_v1  ;;  %1845 = vmatprep.subr.bf16.mxu1 %v1850_v1  ;;  %v93_v10 = vpack.c.bf16 %v32_v8, %v31_v7  ;;  %v34_v12 = vld [vmem:[%s2768_s0 + $0x38] sm:$0xff]  ;;  %v35_v13 = vld [vmem:[%s2768_s0 + $0x40] sm:$0xff]  ;;  %v36_v14 = vld [vmem:[%s2768_s0 + $0x48] sm:$0xff] }
   0x5   :  { %1620 = vmatprep.mubr.msk.bf16.mxu0 %vm146_vm0, %v91_v4  ;;  %v59_v15 = vld [vmem:[%s2768_s0 + $0x100] sm:$0xff]  ;;  %v60_v16 = vld [vmem:[%s2768_s0 + $0x108] sm:$0xff]  ;;  %v61_v17 = vld [vmem:[%s2768_s0 + $0x110] sm:$0xff]  ;;  %v94_v19 = vpack.c.bf16 %v34_v12, %v33_v11  ;;  %v95_v24 = vpack.c.bf16 %v36_v14, %v35_v13 }
   0x6   :  { %v62_v18 = vld [vmem:[%s2768_s0 + $0x118] sm:$0xff]  ;;  %v107_v20 = vpack.c.bf16 %v60_v16, %v59_v15  ;;  %v63_v22 = vld [vmem:[%s2768_s0 + $0x120] sm:$0xff]  ;;  %v64_v23 = vld [vmem:[%s2768_s0 + $0x128] sm:$0xff] }
   0x7   :  { %1619 = vmatpush3.bf16.msra.mxu0 %v1850_v1  ;;  %1847 = vmatpush3.bf16.msra.mxu1 %v1850_v1  ;;  %v108_v21 = vpack.c.bf16 %v62_v18, %v61_v17  ;;  %v109_v25 = vpack.c.bf16 %v64_v23, %v63_v22  ;;  %v37_v26 = vld [vmem:[%s2768_s0 + $0x50] sm:$0xff]  ;;  %v66_v28 = vld [vmem:[%s2768_s0 + $0x138] sm:$0xff]  ;;  %v67_v30 = vld [vmem:[%s2768_s0 + $0x140] sm:$0xff] }
   0x8   :  { %1652 = vmatprep.mubr.msk.bf16.mxu1 %vm146_vm0, %v107_v20  ;;  %v65_v27 = vld [vmem:[%s2768_s0 + $0x130] sm:$0xff]  ;;  %v38_v29 = vld [vmem:[%s2768_s0 + $0x58] sm:$0xff]  ;;  %v68_v31 = vld [vmem:[%s2768_s0 + $0x148] sm:$0xff] }
   0x9   :  { %v39_v32 = vld [vmem:[%s2768_s0 + $0x60] sm:$0xff]  ;;  %v40_v33 = vld [vmem:[%s2768_s0 + $0x68] sm:$0xff]  ;;  %v110_v34 = vpack.c.bf16 %v66_v28, %v65_v27  ;;  %v96_v35 = vpack.c.bf16 %v38_v29, %v37_v26  ;;  %v111_v36 = vpack.c.bf16 %v68_v31, %v67_v30  ;;  %v69_v38 = vld [vmem:[%s2768_s0 + $0x150] sm:$0xff] }
   0xa   :  { %1621 = vmatmul.mubr.msk.bf16.vlgmr.msra.gmra.mxu0 %vm146_vm0, %v92_v9  ;;  %1653 = vmatmul.mubr.msk.bf16.vlgmr.msra.gmra.mxu1 %vm146_vm0, %v108_v21  ;;  %v97_v37 = vpack.c.bf16 %v40_v33, %v39_v32  ;;  %v70_v39 = vld [vmem:[%s2768_s0 + $0x158] sm:$0xff]  ;;  %v41_v41 = vld [vmem:[%s2768_s0 + $0x70] sm:$0xff]  ;;  %v43_v44 = vld [vmem:[%s2768_s0 + $0x80] sm:$0xff] }
   0xb   :  { %1624 = vmatprep.mubr.msk.bf16.mxu0 %vm146_vm0, %v93_v10  ;;  %1656 = vmatprep.mubr.msk.bf16.mxu1 %vm146_vm0, %v109_v25  ;;  %v1851_v40 = vld [vmem:[%s2769_s3 + $0x38] sm:$0xff]   ;;  %v1852_v43 = vld [vmem:[%s2769_s3 + $0x30] sm:$0xff]   ;;  %v71_v45 = vld [vmem:[%s2768_s0 + $0x160] sm:$0xff]  ;;  %v112_v48 = vpack.c.bf16 %v70_v39, %v69_v38 }
   0xc   :  { %v42_v42 = vld [vmem:[%s2768_s0 + $0x78] sm:$0xff]  ;;  %v72_v46 = vld [vmem:[%s2768_s0 + $0x168] sm:$0xff]  ;;  %1684 = vmatprep.subr.bf16.mxu1 %v1851_v40  ;;  %v1854_v53 = vld [vmem:[%s2769_s3 + $0x20] sm:$0xff]  }
   0xd   :  { %v44_v47 = vld [vmem:[%s2768_s0 + $0x88] sm:$0xff]  ;;  %1685 = vmatpush3.bf16.msra.mxu1 %v1851_v40  ;;  %v98_v50 = vpack.c.bf16 %v42_v42, %v41_v41  ;;  %v113_v51 = vpack.c.bf16 %v72_v46, %v71_v45  ;;  %v45_v54 = vld [vmem:[%s2768_s0 + $0x90] sm:$0xff]  ;;  %v74_v56 = vld [vmem:[%s2768_s0 + $0x178] sm:$0xff] }
   0xe   :  { %1686 = vmatprep.subr.bf16.mxu1 %v1852_v43  ;;  %v1853_v49 = vld [vmem:[%s2769_s3 + $0x28] sm:$0xff]   ;;  %v99_v52 = vpack.c.bf16 %v44_v47, %v43_v44  ;;  %v73_v55 = vld [vmem:[%s2768_s0 + $0x170] sm:$0xff]  ;;  %v46_v57 = vld [vmem:[%s2768_s0 + $0x98] sm:$0xff] }
   0xf   :  { %v75_v58 = vld [vmem:[%s2768_s0 + $0x180] sm:$0xff]  ;;  %v76_v59 = vld [vmem:[%s2768_s0 + $0x188] sm:$0xff]  ;;  %v114_v62 = vpack.c.bf16 %v74_v56, %v73_v55  ;;  %v1855_v63 = vld [vmem:[%s2769_s3 + $0x18] sm:$0xff]   ;;  %v100_v0 = vpack.c.bf16 %v46_v57, %v45_v54 }
  0x10   :  { %v47_v60 = vld [vmem:[%s2768_s0 + $0xa0] sm:$0xff]  ;;  %v48_v61 = vld [vmem:[%s2768_s0 + $0xa8] sm:$0xff]  ;;  %v115_v1 = vpack.c.bf16 %v76_v59, %v75_v58  ;;  %v1856_v3 = vld [vmem:[%s2769_s3 + $0x10] sm:$0xff]   ;;  %v1867_v59 = vmov 0  }
  0x11   :  { %1687 = vmatpush3.bf16.msra.mxu1 %v1852_v43  ;;  %v101_v2 = vpack.c.bf16 %v48_v61, %v47_v60  ;;  %v49_v4 = vld [vmem:[%s2768_s0 + $0xb0] sm:$0xff]  ;;  %v78_v6 = vld [vmem:[%s2768_s0 + $0x198] sm:$0xff]  ;;  %v79_v8 = vld [vmem:[%s2768_s0 + $0x1a0] sm:$0xff] }
  0x12   :  { %1625 = vmatmul.mubr.msk.bf16.gmra.mxu0 %vm146_vm0, %v94_v19  ;;  %1657 = vmatmul.mubr.msk.bf16.gmra.mxu1 %vm146_vm0, %v110_v34  ;;  %v77_v5 = vld [vmem:[%s2768_s0 + $0x190] sm:$0xff]  ;;  %v50_v7 = vld [vmem:[%s2768_s0 + $0xb8] sm:$0xff]  ;;  %v80_v9 = vld [vmem:[%s2768_s0 + $0x1a8] sm:$0xff] }
  0x13   :  { %1628 = vmatprep.mubr.msk.bf16.mxu0 %vm146_vm0, %v95_v24  ;;  %1660 = vmatprep.mubr.msk.bf16.mxu1 %vm146_vm0, %v111_v36  ;;  %v51_v10 = vld [vmem:[%s2768_s0 + $0xc0] sm:$0xff]  ;;  %v52_v11 = vld [vmem:[%s2768_s0 + $0xc8] sm:$0xff]  ;;  %v116_v12 = vpack.c.bf16 %v78_v6, %v77_v5  ;;  %v102_v14 = vpack.c.bf16 %v50_v7, %v49_v4  ;;  %v117_v15 = vpack.c.bf16 %v80_v9, %v79_v8  ;;  %v53_v17 = vld [vmem:[%s2768_s0 + $0xd0] sm:$0xff] }
  0x14   :  { %1688 = vmatprep.subr.bf16.mxu1 %v1853_v49  ;;  %v1857_v13 = vld [vmem:[%s2769_s3 + $0x8] sm:$0xff]   ;;  %v103_v16 = vpack.c.bf16 %v52_v11, %v51_v10  ;;  %v81_v18 = vld [vmem:[%s2768_s0 + $0x1b0] sm:$0xff]  ;;  %v82_v19 = vld [vmem:[%s2768_s0 + $0x1b8] sm:$0xff] }
  0x15   :  { %1689 = vmatpush3.bf16.msra.mxu1 %v1853_v49  ;;  %v54_v20 = vld [vmem:[%s2768_s0 + $0xd8] sm:$0xff]  ;;  %v83_v21 = vld [vmem:[%s2768_s0 + $0x1c0] sm:$0xff]  ;;  %v84_v22 = vld [vmem:[%s2768_s0 + $0x1c8] sm:$0xff]  ;;  %v118_v25 = vpack.c.bf16 %v82_v19, %v81_v18 }
  0x16   :  { %1690 = vmatprep.subr.bf16.mxu1 %v1854_v53  ;;  %v55_v23 = vld [vmem:[%s2768_s0 + $0xe0] sm:$0xff]  ;;  %v56_v24 = vld [vmem:[%s2768_s0 + $0xe8] sm:$0xff]  ;;  %v104_v26 = vpack.c.bf16 %v54_v20, %v53_v17  ;;  %v119_v27 = vpack.c.bf16 %v84_v22, %v83_v21  ;;  %v57_v29 = vld [vmem:[%s2768_s0 + $0xf0] sm:$0xff] }
  0x17   :  { %v105_v28 = vpack.c.bf16 %v56_v24, %v55_v23  ;;  %v85_v30 = vld [vmem:[%s2768_s0 + $0x1d0] sm:$0xff]  ;;  %v86_v31 = vld [vmem:[%s2768_s0 + $0x1d8] sm:$0xff]  ;;  %v87_v33 = vld [vmem:[%s2768_s0 + $0x1e0] sm:$0xff] }
  0x18   :  { %v58_v32 = vld [vmem:[%s2768_s0 + $0xf8] sm:$0xff]  ;;  %v88_v34 = vld [vmem:[%s2768_s0 + $0x1e8] sm:$0xff]  ;;  %v89_v38 = vld [vmem:[%s2768_s0 + $0x1f0] sm:$0xff] }
  0x19   :  { %1691 = vmatpush3.bf16.msra.mxu1 %v1854_v53  ;;  %v106_v36 = vpack.c.bf16 %v58_v32, %v57_v29  ;;  %v90_v39 = vld [vmem:[%s2768_s0 + $0x1f8] sm:$0xff]  ;;  %v1858_v41 = vld [vmem:[%s2769_s3] sm:$0xff]   ;;  %v1860_v55 = vld [vmem:[%s2771_s5 + $0x30] sm:$0xff]  }
  0x1a   :  { %1629 = vmatmul.mubr.msk.bf16.gmra.mxu0 %vm146_vm0, %v96_v35  ;;  %1661 = vmatmul.mubr.msk.bf16.gmra.mxu1 %vm146_vm0, %v112_v48  ;;  %v120_v35 = vpack.c.bf16 %v86_v31, %v85_v30  ;;  %v122_v40 = vpack.c.bf16 %v90_v39, %v89_v38  ;;  %v2165_v44 = vld [vmem:[%s2770_s2] ss:$0 sm:$0xff] }
  0x1b   :  { %1632 = vmatprep.mubr.msk.bf16.mxu0 %vm146_vm0, %v97_v37  ;;  %1664 = vmatprep.mubr.msk.bf16.mxu1 %vm146_vm0, %v113_v51  ;;  %v121_v37 = vpack.c.bf16 %v88_v34, %v87_v33  ;;  %v1862_v8 = vld [vmem:[%s2771_s5 + $0x20] sm:$0xff]   ;;  %v1865_v33 = vld [vmem:[%s2771_s5 + $0x8] sm:$0xff]  }
  0x1c   :  { %1692 = vmatprep.subr.bf16.mxu1 %v1855_v63 }
  0x1d   :  { %1693 = vmatpush3.bf16.msra.mxu1 %v1855_v63 }
  0x1e   :  { %1694 = vmatprep.subr.bf16.mxu1 %v1856_v3 }
  0x21   :  { %1695 = vmatpush3.bf16.msra.mxu1 %v1856_v3 }
  0x22   :  { %1633 = vmatmul.mubr.msk.bf16.gmra.mxu0 %vm146_vm0, %v98_v50  ;;  %1665 = vmatmul.mubr.msk.bf16.gmra.mxu1 %vm146_vm0, %v114_v62  ;;  %v1861_v62 = vld [vmem:[%s2771_s5 + $0x28] sm:$0xff]  }
  0x23   :  { %1636 = vmatprep.mubr.msk.bf16.mxu0 %vm146_vm0, %v99_v52  ;;  %1668 = vmatprep.mubr.msk.bf16.mxu1 %vm146_vm0, %v115_v1  ;;  %v1859_v52 = vld [vmem:[%s2771_s5 + $0x38] sm:$0xff]  }
  0x24   :  { %1696 = vmatprep.subr.bf16.mxu1 %v1857_v13  ;;  %1764 = vmatprep.subr.bf16.mxu0 %v1859_v52 }
  0x25   :  { %1697 = vmatpush3.bf16.msra.mxu1 %v1857_v13  ;;  %1765 = vmatpush3.bf16.msra.mxu0 %v1859_v52 }
  0x26   :  { %1698 = vmatprep.subr.bf16.mxu1 %v1858_v41  ;;  %1766 = vmatprep.subr.bf16.mxu0 %v1860_v55 }
  0x29   :  { %1699 = vmatpush3.bf16.msra.mxu1 %v1858_v41  ;;  %1767 = vmatpush3.bf16.msra.mxu0 %v1860_v55 }
  0x2a   :  { %1637 = vmatmul.mubr.msk.bf16.gmra.mxu0 %vm146_vm0, %v100_v0  ;;  %1669 = vmatmul.mubr.msk.bf16.gmra.mxu1 %vm146_vm0, %v116_v12 }
  0x2b   :  { %1640 = vmatprep.mubr.msk.bf16.mxu0 %vm146_vm0, %v101_v2  ;;  %1672 = vmatprep.mubr.msk.bf16.mxu1 %vm146_vm0, %v117_v15 }
  0x2c   :  { %1768 = vmatprep.subr.bf16.mxu0 %v1861_v62 }
  0x2d   :  { %1769 = vmatpush3.bf16.msra.mxu0 %v1861_v62 }
  0x2e   :  { %1770 = vmatprep.subr.bf16.mxu0 %v1862_v8 }
  0x31   :  { %1771 = vmatpush3.bf16.msra.mxu0 %v1862_v8 }
  0x32   :  { %1641 = vmatmul.mubr.msk.bf16.gmra.mxu0 %vm146_vm0, %v102_v14  ;;  %1673 = vmatmul.mubr.msk.bf16.gmra.mxu1 %vm146_vm0, %v118_v25 }
  0x33   :  { %1644 = vmatprep.mubr.msk.bf16.mxu0 %vm146_vm0, %v103_v16  ;;  %1676 = vmatprep.mubr.msk.bf16.mxu1 %vm146_vm0, %v119_v27  ;;  %v1863_v16 = vld [vmem:[%s2771_s5 + $0x18] sm:$0xff]  }
  0x34   :  { %1772 = vmatprep.subr.bf16.mxu0 %v1863_v16 }
  0x35   :  { %1773 = vmatpush3.bf16.msra.mxu0 %v1863_v16 }
  0x3a   :  { %1645 = vmatmul.mubr.msk.bf16.gmra.mxu0 %vm146_vm0, %v104_v26  ;;  %1677 = vmatmul.mubr.msk.bf16.gmra.mxu1 %vm146_vm0, %v120_v35  ;;  %v1864_v26 = vld [vmem:[%s2771_s5 + $0x10] sm:$0xff]  }
  0x3b   :  { %1648 = vmatprep.mubr.msk.bf16.mxu0 %vm146_vm0, %v105_v28  ;;  %1680 = vmatprep.mubr.msk.bf16.mxu1 %vm146_vm0, %v121_v37 }
  0x3c   :  { %1774 = vmatprep.subr.bf16.mxu0 %v1864_v26 }
  0x3d   :  { %1775 = vmatpush3.bf16.msra.mxu0 %v1864_v26 }
  0x3e   :  { %1776 = vmatprep.subr.bf16.mxu0 %v1865_v33 }
  0x41   :  { %1777 = vmatpush3.bf16.msra.mxu0 %v1865_v33 }
  0x42   :  { %1649 = vmatmul.mubr.msk.bf16.gmra.mxu0 %vm146_vm0, %v106_v36  ;;  %1681 = vmatmul.mubr.msk.bf16.gmra.mxu1 %vm146_vm0, %v122_v40 }
  0xca   :  { %v1622_v42 = vpop.f32.mrf.mxu0  ;;  %v2171_v51 = vpop.f32.mrf.mxu1 }
  0xcb   :  { %v286_v47 = vadd.f32 %v1622_v42, %v2165_v44 }
  0xcc   :  { %v277_v43 = vpop.f32.mrf.mxu0  ;;  %v2179_v57 = vpop.f32.mrf.mxu1 }
  0xcd   :  { %v278_v49 = vadd.f32 %v2165_v44, %v277_v43 }
  0xce   :  { %v1623_v45 = vpop.f32.mrf.mxu0  ;;  %v2182_v61 = vpop.f32.mrf.mxu1 }
  0xcf   :  { %v289_v46 = vadd.f32 %v1623_v45, %v2165_v44 }
  0xd0   :  { %v280_v48 = vpop.f32.mrf.mxu0  ;;  %v2189_v2 = vpop.f32.mrf.mxu1 }
  0xd1   :  { %v281_v50 = vadd.f32 %v2165_v44, %v280_v48  ;;  %v533_v53 = vpack.c.bf16 %v289_v46, %v286_v47 }
  0xd2   :  { %v1626_v54 = vpop.f32.mrf.mxu0  ;;  %v2194_v7 = vpop.f32.mrf.mxu1 }
  0xd3   :  { %v532_v56 = vpack.c.bf16 %v281_v50, %v278_v49  ;;  %v565_v63 = vmax.bf16 %v1867_v59, %v533_v53  ;;  %v302_v3 = vadd.f32 %v1626_v54, %v2165_v44 }
  0xd4   :  { %v293_v58 = vpop.f32.mrf.mxu0  ;;  %v2199_v12 = vpop.f32.mrf.mxu1 }
  0xd5   :  { %v564_v60 = vmax.bf16 %v1867_v59, %v532_v56  ;;  %v294_v5 = vadd.f32 %v2165_v44, %v293_v58 }
  0xd6   :  { %v1627_v0 = vpop.f32.mrf.mxu0  ;;  %v2202_v15 = vpop.f32.mrf.mxu1 }
  0xd7   :  { %v305_v1 = vadd.f32 %v1627_v0, %v2165_v44  ;;  %1700 = vmatprep.mubr.bf16.mxu1 %v564_v60 }
  0xd8   :  { %v296_v4 = vpop.f32.mrf.mxu0  ;;  %1701 = vmatmul.mubr.bf16.vlgmr.msra.gmra.mxu1 %v565_v63  ;;  %v2209_v20 = vpop.f32.mrf.mxu1 }
  0xd9   :  { %v297_v6 = vadd.f32 %v2165_v44, %v296_v4  ;;  %v535_v9 = vpack.c.bf16 %v305_v1, %v302_v3 }
  0xda   :  { %v1630_v10 = vpop.f32.mrf.mxu0  ;;  %v2214_v25 = vpop.f32.mrf.mxu1 }
  0xdb   :  { %v534_v11 = vpack.c.bf16 %v297_v6, %v294_v5  ;;  %v567_v18 = vmax.bf16 %v1867_v59, %v535_v9  ;;  %v318_v21 = vadd.f32 %v1630_v10, %v2165_v44 }
  0xdc   :  { %v309_v13 = vpop.f32.mrf.mxu0  ;;  %v2219_v30 = vpop.f32.mrf.mxu1 }
  0xdd   :  { %v566_v14 = vmax.bf16 %v1867_v59, %v534_v11  ;;  %v310_v23 = vadd.f32 %v2165_v44, %v309_v13 }
  0xde   :  { %v1631_v17 = vpop.f32.mrf.mxu0  ;;  %v2226_v36 = vpop.f32.mrf.mxu1 }
  0xdf   :  { %v321_v19 = vadd.f32 %v1631_v17, %v2165_v44  ;;  %1704 = vmatprep.mubr.bf16.mxu1 %v566_v14 }
  0xe0   :  { %v312_v22 = vpop.f32.mrf.mxu0  ;;  %1705 = vmatmul.mubr.bf16.gmra.mxu1 %v567_v18  ;;  %v2232_v45 = vpop.f32.mrf.mxu1 }
  0xe1   :  { %v313_v24 = vadd.f32 %v2165_v44, %v312_v22  ;;  %v537_v27 = vpack.c.bf16 %v321_v19, %v318_v21 }
  0xe2   :  { %v1634_v28 = vpop.f32.mrf.mxu0  ;;  %v2236_v52 = vpop.f32.mrf.mxu1 }
  0xe3   :  { %v536_v29 = vpack.c.bf16 %v313_v24, %v310_v23  ;;  %v569_v35 = vmax.bf16 %v1867_v59, %v537_v27  ;;  %v334_v38 = vadd.f32 %v1634_v28, %v2165_v44 }
  0xe4   :  { %v325_v31 = vpop.f32.mrf.mxu0  ;;  %v2242_v63 = vpop.f32.mrf.mxu1 }
  0xe5   :  { %v568_v32 = vmax.bf16 %v1867_v59, %v536_v29  ;;  %v326_v40 = vadd.f32 %v2165_v44, %v325_v31 }
  0xe6   :  { %v1635_v34 = vpop.f32.mrf.mxu0  ;;  %v2246_v6 = vpop.f32.mrf.mxu1 }
  0xe7   :  { %v337_v37 = vadd.f32 %v1635_v34, %v2165_v44  ;;  %1708 = vmatprep.mubr.bf16.mxu1 %v568_v32 }
  0xe8   :  { %v328_v39 = vpop.f32.mrf.mxu0  ;;  %1709 = vmatmul.mubr.bf16.gmra.mxu1 %v569_v35  ;;  %v2252_v17 = vpop.f32.mrf.mxu1 }
  0xe9   :  { %v329_v41 = vadd.f32 %v2165_v44, %v328_v39  ;;  %v539_v42 = vpack.c.bf16 %v337_v37, %v334_v38  ;;  %v406_v38 = vadd.f32 %v2165_v44, %v2179_v57 }
  0xea   :  { %v1638_v43 = vpop.f32.mrf.mxu0  ;;  %v2256_v24 = vpop.f32.mrf.mxu1 }
  0xeb   :  { %v538_v46 = vpack.c.bf16 %v329_v41, %v326_v40  ;;  %v571_v50 = vmax.bf16 %v1867_v59, %v539_v42  ;;  %v350_v54 = vadd.f32 %v1638_v43, %v2165_v44  ;;  %v409_v40 = vadd.f32 %v2165_v44, %v2189_v2 }
  0xec   :  { %v341_v47 = vpop.f32.mrf.mxu0  ;;  %v469_v34 = vpop.f32.mrf.mxu1 }
  0xed   :  { %v570_v48 = vmax.bf16 %v1867_v59, %v538_v46  ;;  %v342_v56 = vadd.f32 %v2165_v44, %v341_v47 }
  0xee   :  { %v1639_v49 = vpop.f32.mrf.mxu0  ;;  %v2268_v43 = vpop.f32.mrf.mxu1 }
  0xef   :  { %v353_v53 = vadd.f32 %v1639_v49, %v2165_v44  ;;  %1712 = vmatprep.mubr.bf16.mxu1 %v570_v48 }
  0xf0   :  { %v344_v55 = vpop.f32.mrf.mxu0  ;;  %1713 = vmatmul.mubr.bf16.gmra.mxu1 %v571_v50  ;;  %v548_v50 = vpack.c.bf16 %v409_v40, %v406_v38 }
  0xf1   :  { %v345_v58 = vadd.f32 %v2165_v44, %v344_v55  ;;  %v541_v60 = vpack.c.bf16 %v353_v53, %v350_v54  ;;  %v472_v54 = vpop.f32.mrf.mxu1  ;;  %v422_v55 = vadd.f32 %v2165_v44, %v2199_v12 }
  0xf2   :  { %v1642_v62 = vpop.f32.mrf.mxu0 }
  0xf3   :  { %v540_v0 = vpack.c.bf16 %v345_v58, %v342_v56  ;;  %v573_v5 = vmax.bf16 %v1867_v59, %v541_v60  ;;  %v366_v9 = vadd.f32 %v1642_v62, %v2165_v44  ;;  %v580_v58 = vmax.bf16 %v1867_v59, %v548_v50 }
  0xf4   :  { %v357_v1 = vpop.f32.mrf.mxu0  ;;  %v425_v60 = vadd.f32 %v2165_v44, %v2209_v20  ;;  %v414_v62 = vadd.f32 %v2171_v51, %v2165_v44  ;;  %v441_v51 = vadd.f32 %v2165_v44, %v2232_v45  ;;  %v457_v45 = vadd.f32 %v2165_v44, %v2252_v17 }
  0xf5   :  { %v572_v3 = vmax.bf16 %v1867_v59, %v540_v0  ;;  %v358_v11 = vadd.f32 %v2165_v44, %v357_v1  ;;  %v417_v0 = vadd.f32 %v2182_v61, %v2165_v44  ;;  %v430_v61 = vadd.f32 %v2194_v7, %v2165_v44 }
  0xf6   :  { %v1643_v4 = vpop.f32.mrf.mxu0  ;;  %v550_v12 = vpack.c.bf16 %v425_v60, %v422_v55  ;;  %v446_v7 = vadd.f32 %v2214_v25, %v2165_v44  ;;  %v470_v17 = vadd.f32 %v2165_v44, %v469_v34 }
  0xf7   :  { %v369_v8 = vadd.f32 %v1643_v4, %v2165_v44  ;;  %1716 = vmatprep.mubr.bf16.mxu1 %v572_v3  ;;  %v1674_v3 = vpop.f32.mrf.mxu1  ;;  %v549_v4 = vpack.c.bf16 %v417_v0, %v414_v62 }
  0xf8   :  { %v360_v10 = vpop.f32.mrf.mxu0  ;;  %1717 = vmatmul.mubr.bf16.gmra.mxu1 %v573_v5  ;;  %v582_v20 = vmax.bf16 %v1867_v59, %v550_v12 }
  0xf9   :  { %v361_v13 = vadd.f32 %v2165_v44, %v360_v10  ;;  %v543_v14 = vpack.c.bf16 %v369_v8, %v366_v9  ;;  %v485_v5 = vpop.f32.mrf.mxu1  ;;  %v438_v8 = vadd.f32 %v2165_v44, %v2219_v30  ;;  %v433_v9 = vadd.f32 %v2202_v15, %v2165_v44 }
  0xfa   :  { %v1646_v16 = vpop.f32.mrf.mxu0  ;;  %v581_v10 = vmax.bf16 %v1867_v59, %v549_v4  ;;  %v454_v30 = vadd.f32 %v2165_v44, %v2242_v63  ;;  %v449_v15 = vadd.f32 %v2226_v36, %v2165_v44  ;;  %v473_v36 = vadd.f32 %v2165_v44, %v472_v54 }
  0xfb   :  { %v542_v18 = vpack.c.bf16 %v361_v13, %v358_v11  ;;  %v575_v23 = vmax.bf16 %v1867_v59, %v543_v14  ;;  %v382_v27 = vadd.f32 %v1646_v16, %v2165_v44  ;;  %v1675_v11 = vpop.f32.mrf.mxu1  ;;  %v552_v13 = vpack.c.bf16 %v441_v51, %v438_v8 }
  0xfc   :  { %v373_v19 = vpop.f32.mrf.mxu0  ;;  %v551_v14 = vpack.c.bf16 %v433_v9, %v430_v61  ;;  %v554_v63 = vpack.c.bf16 %v457_v45, %v454_v30  ;;  %v486_v34 = vadd.f32 %v2165_v44, %v485_v5 }
  0xfd   :  { %v574_v21 = vmax.bf16 %v1867_v59, %v542_v18  ;;  %v374_v29 = vadd.f32 %v2165_v44, %v373_v19  ;;  %v488_v16 = vpop.f32.mrf.mxu1  ;;  %v584_v18 = vmax.bf16 %v1867_v59, %v552_v13 }
  0xfe   :  { %v1647_v22 = vpop.f32.mrf.mxu0  ;;  %v583_v19 = vmax.bf16 %v1867_v59, %v551_v14  ;;  %v586_v25 = vmax.bf16 %v1867_v59, %v554_v63  ;;  %v489_v38 = vadd.f32 %v2165_v44, %v488_v16 }
  0xff   :  { %v385_v26 = vadd.f32 %v1647_v22, %v2165_v44  ;;  %1720 = vmatprep.mubr.bf16.mxu1 %v574_v21  ;;  %v1678_v21 = vpop.f32.mrf.mxu1  ;;  %v1866_v22 = vld [vmem:[%s2771_s5] sm:$0xff]  }
 0x100   :  { %v376_v28 = vpop.f32.mrf.mxu0  ;;  %1721 = vmatmul.mubr.bf16.gmra.mxu1 %v575_v23  ;;  %v553_v23 = vpack.c.bf16 %v449_v15, %v446_v7  ;;  %1778 = vmatprep.subr.bf16.mxu0 %v1866_v22  ;;  %v510_v60 = vadd.f32 %v1678_v21, %v2165_v44 }
 0x101   :  { %v377_v31 = vadd.f32 %v2165_v44, %v376_v28  ;;  %v545_v32 = vpack.c.bf16 %v385_v26, %v382_v27  ;;  %v501_v26 = vpop.f32.mrf.mxu1  ;;  %1779 = vmatpush3.bf16.msra.mxu0 %v1866_v22  ;;  %v462_v27 = vadd.f32 %v2236_v52, %v2165_v44  ;;  %v465_v28 = vadd.f32 %v2246_v6, %v2165_v44 }
 0x102   :  { %v1650_v33 = vpop.f32.mrf.mxu0  ;;  %v478_v52 = vadd.f32 %v2256_v24, %v2165_v44  ;;  %v481_v6 = vadd.f32 %v2268_v43, %v2165_v44  ;;  %v497_v24 = vadd.f32 %v1675_v11, %v2165_v44 }
 0x103   :  { %v544_v35 = vpack.c.bf16 %v377_v31, %v374_v29  ;;  %v577_v42 = vmax.bf16 %v1867_v59, %v545_v32  ;;  %v398_v47 = vadd.f32 %v1650_v33, %v2165_v44  ;;  %v585_v29 = vmax.bf16 %v1867_v59, %v553_v23  ;;  %v1679_v31 = vpop.f32.mrf.mxu1 }
 0x104   :  { %v389_v37 = vpop.f32.mrf.mxu0  ;;  %v556_v32 = vpack.c.bf16 %v473_v36, %v470_v17  ;;  %v555_v33 = vpack.c.bf16 %v465_v28, %v462_v27  ;;  %v513_v62 = vadd.f32 %v1679_v31, %v2165_v44 }
 0x105   :  { %v576_v39 = vmax.bf16 %v1867_v59, %v544_v35  ;;  %v390_v49 = vadd.f32 %v2165_v44, %v389_v37  ;;  %v504_v35 = vpop.f32.mrf.mxu1 }
 0x106   :  { %v1651_v41 = vpop.f32.mrf.mxu0  ;;  %v588_v37 = vmax.bf16 %v1867_v59, %v556_v32 }
 0x107   :  { %v401_v46 = vadd.f32 %v1651_v41, %v2165_v44  ;;  %1724 = vmatprep.mubr.bf16.mxu1 %v576_v39  ;;  %v587_v39 = vmax.bf16 %v1867_v59, %v555_v33  ;;  %v1682_v40 = vpop.f32.mrf.mxu1  ;;  %v558_v41 = vpack.c.bf16 %v489_v38, %v486_v34 }
 0x108   :  { %v392_v48 = vpop.f32.mrf.mxu0  ;;  %1725 = vmatmul.mubr.bf16.gmra.mxu1 %v577_v42  ;;  %v557_v42 = vpack.c.bf16 %v481_v6, %v478_v52  ;;  %v526_v4 = vadd.f32 %v1682_v40, %v2165_v44 }
 0x109   :  { %v393_v57 = vadd.f32 %v2165_v44, %v392_v48  ;;  %v547_v53 = vpack.c.bf16 %v401_v46, %v398_v47  ;;  %v517_v46 = vpop.f32.mrf.mxu1  ;;  %v502_v47 = vadd.f32 %v2165_v44, %v501_v26  ;;  %v590_v48 = vmax.bf16 %v1867_v59, %v558_v41 }
 0x10a   :  { %v589_v43 = vmax.bf16 %v1867_v59, %v557_v42  ;;  %v518_v55 = vadd.f32 %v2165_v44, %v517_v46 }
 0x10b   :  { %v546_v2 = vpack.c.bf16 %v393_v57, %v390_v49  ;;  %v579_v1 = vmax.bf16 %v1867_v59, %v547_v53  ;;  %v505_v49 = vadd.f32 %v2165_v44, %v504_v35  ;;  %v494_v57 = vadd.f32 %v1674_v3, %v2165_v44  ;;  %v1683_v50 = vpop.f32.mrf.mxu1 }
 0x10c   :  { %v561_v3 = vpack.c.bf16 %v513_v62, %v510_v60  ;;  %v529_v5 = vadd.f32 %v1683_v50, %v2165_v44 }
 0x10d   :  { %v578_v56 = vmax.bf16 %v1867_v59, %v546_v2  ;;  %v560_v53 = vpack.c.bf16 %v505_v49, %v502_v47  ;;  %v559_v54 = vpack.c.bf16 %v497_v24, %v494_v57  ;;  %v520_v2 = vpop.f32.mrf.mxu1 }
 0x10e   :  { %v593_v8 = vmax.bf16 %v1867_v59, %v561_v3 }
 0x10f   :  { %1728 = vmatprep.mubr.bf16.mxu1 %v578_v56  ;;  %v592_v56 = vmax.bf16 %v1867_v59, %v560_v53  ;;  %v591_v0 = vmax.bf16 %v1867_v59, %v559_v54 }
 0x110   :  { %1729 = vmatmul.mubr.bf16.gmra.mxu1 %v579_v1 }
 0x111   :  { %1732 = vmatprep.mubr.bf16.mxu1 %v580_v58  ;;  %v521_v58 = vadd.f32 %v2165_v44, %v520_v2 }
 0x113   :  { %v562_v1 = vpack.c.bf16 %v521_v58, %v518_v55 }
 0x115   :  { %v594_v12 = vmax.bf16 %v1867_v59, %v562_v1 }
 0x118   :  { %1733 = vmatmul.mubr.bf16.gmra.mxu1 %v581_v10  ;;  %v2344_v10 = vld [vmem:[%s2772_s4] ss:$0 sm:$0xff] }
 0x119   :  { %1736 = vmatprep.mubr.bf16.mxu1 %v582_v20  ;;  %v563_v20 = vpack.c.bf16 %v529_v5, %v526_v4 }
 0x11b   :  { %v595_v51 = vmax.bf16 %v1867_v59, %v563_v20 }
 0x120   :  { %1737 = vmatmul.mubr.bf16.gmra.mxu1 %v583_v19 }
 0x121   :  { %1740 = vmatprep.mubr.bf16.mxu1 %v584_v18 }
 0x128   :  { %1741 = vmatmul.mubr.bf16.gmra.mxu1 %v585_v29 }
 0x129   :  { %1744 = vmatprep.mubr.bf16.mxu1 %v586_v25 }
 0x130   :  { %1745 = vmatmul.mubr.bf16.gmra.mxu1 %v587_v39 }
 0x131   :  { %1748 = vmatprep.mubr.bf16.mxu1 %v588_v37 }
 0x138   :  { %1749 = vmatmul.mubr.bf16.gmra.mxu1 %v589_v43 }
 0x139   :  { %1752 = vmatprep.mubr.bf16.mxu1 %v590_v48 }
 0x140   :  { %1753 = vmatmul.mubr.bf16.gmra.mxu1 %v591_v0 }
 0x141   :  { %1756 = vmatprep.mubr.bf16.mxu1 %v592_v56 }
 0x148   :  { %1757 = vmatmul.mubr.bf16.gmra.mxu1 %v593_v8 }
 0x149   :  { %1760 = vmatprep.mubr.bf16.mxu1 %v594_v12 }
 0x150   :  { %1761 = vmatmul.mubr.bf16.gmra.mxu1 %v595_v51 }
 0x198   :  { %v1702_v61 = vpop.f32.mrf.mxu1 }
 0x199   :  { %v710_v44 = vadd.f32 %v1702_v61, %v2344_v10 }
 0x19a   :  { %v701_v9 = vpop.f32.mrf.mxu1 }
 0x19b   :  { %v702_v16 = vadd.f32 %v2344_v10, %v701_v9 }
 0x19c   :  { %v1703_v11 = vpop.f32.mrf.mxu1 }
 0x19d   :  { %v713_v13 = vadd.f32 %v1703_v11, %v2344_v10 }
 0x19e   :  { %v704_v14 = vpop.f32.mrf.mxu1 }
 0x19f   :  { %v705_v30 = vadd.f32 %v2344_v10, %v704_v14  ;;  %v957_v18 = vpack.c.bf16 %v713_v13, %v710_v44 }
 0x1a0   :  { %v1706_v45 = vpop.f32.mrf.mxu1 }
 0x1a1   :  { %v956_v7 = vpack.c.bf16 %v705_v30, %v702_v16  ;;  %v989_v21 = vmax.bf16 %v1867_v59, %v957_v18  ;;  %v726_v23 = vadd.f32 %v1706_v45, %v2344_v10 }
 0x1a2   :  { %v717_v15 = vpop.f32.mrf.mxu1 }
 0x1a3   :  { %v988_v19 = vmax.bf16 %v1867_v59, %v956_v7  ;;  %v718_v17 = vadd.f32 %v2344_v10, %v717_v15 }
 0x1a4   :  { %v1707_v22 = vpop.f32.mrf.mxu1 }
 0x1a5   :  { %v729_v63 = vadd.f32 %v1707_v22, %v2344_v10  ;;  %1780 = vmatprep.mubr.bf16.mxu0 %v988_v19 }
 0x1a6   :  { %v720_v26 = vpop.f32.mrf.mxu1  ;;  %1781 = vmatmul.mubr.bf16.vlgmr.msra.gmra.mxu0 %v989_v21 }
 0x1a7   :  { %v721_v25 = vadd.f32 %v2344_v10, %v720_v26  ;;  %v959_v36 = vpack.c.bf16 %v729_v63, %v726_v23 }
 0x1a8   :  { %v1710_v27 = vpop.f32.mrf.mxu1 }
 0x1a9   :  { %v958_v28 = vpack.c.bf16 %v721_v25, %v718_v17  ;;  %v991_v33 = vmax.bf16 %v1867_v59, %v959_v36  ;;  %v742_v34 = vadd.f32 %v1710_v27, %v2344_v10 }
 0x1aa   :  { %v733_v29 = vpop.f32.mrf.mxu1 }
 0x1ab   :  { %v990_v31 = vmax.bf16 %v1867_v59, %v958_v28  ;;  %v734_v38 = vadd.f32 %v2344_v10, %v733_v29 }
 0x1ac   :  { %v1711_v32 = vpop.f32.mrf.mxu1 }
 0x1ad   :  { %v745_v35 = vadd.f32 %v1711_v32, %v2344_v10  ;;  %1784 = vmatprep.mubr.bf16.mxu0 %v990_v31 }
 0x1ae   :  { %v736_v37 = vpop.f32.mrf.mxu1  ;;  %1785 = vmatmul.mubr.bf16.gmra.mxu0 %v991_v33 }
 0x1af   :  { %v737_v52 = vadd.f32 %v2344_v10, %v736_v37  ;;  %v961_v6 = vpack.c.bf16 %v745_v35, %v742_v34 }
 0x1b0   :  { %v1714_v39 = vpop.f32.mrf.mxu1 }
 0x1b1   :  { %v960_v40 = vpack.c.bf16 %v737_v52, %v734_v38  ;;  %v993_v47 = vmax.bf16 %v1867_v59, %v961_v6  ;;  %v758_v49 = vadd.f32 %v1714_v39, %v2344_v10 }
 0x1b2   :  { %v749_v41 = vpop.f32.mrf.mxu1 }
 0x1b3   :  { %v992_v42 = vmax.bf16 %v1867_v59, %v960_v40  ;;  %v750_v24 = vadd.f32 %v2344_v10, %v749_v41 }
 0x1b4   :  { %v1715_v46 = vpop.f32.mrf.mxu1 }
 0x1b5   :  { %v761_v48 = vadd.f32 %v1715_v46, %v2344_v10  ;;  %1788 = vmatprep.mubr.bf16.mxu0 %v992_v42 }
 0x1b6   :  { %v752_v57 = vpop.f32.mrf.mxu1  ;;  %1789 = vmatmul.mubr.bf16.gmra.mxu0 %v993_v47 }
 0x1b7   :  { %v753_v43 = vadd.f32 %v2344_v10, %v752_v57  ;;  %v963_v50 = vpack.c.bf16 %v761_v48, %v758_v49 }
 0x1b8   :  { %v1718_v53 = vpop.f32.mrf.mxu1 }
 0x1b9   :  { %v962_v54 = vpack.c.bf16 %v753_v43, %v750_v24  ;;  %v995_v58 = vmax.bf16 %v1867_v59, %v963_v50  ;;  %v774_v62 = vadd.f32 %v1718_v53, %v2344_v10 }
 0x1ba   :  { %v765_v2 = vpop.f32.mrf.mxu1 }
 0x1bb   :  { %v994_v55 = vmax.bf16 %v1867_v59, %v962_v54  ;;  %v766_v1 = vadd.f32 %v2344_v10, %v765_v2 }
 0x1bc   :  { %v1719_v56 = vpop.f32.mrf.mxu1 }
 0x1bd   :  { %v777_v60 = vadd.f32 %v1719_v56, %v2344_v10  ;;  %1792 = vmatprep.mubr.bf16.mxu0 %v994_v55 }
 0x1be   :  { %v768_v0 = vpop.f32.mrf.mxu1  ;;  %1793 = vmatmul.mubr.bf16.gmra.mxu0 %v995_v58 }
 0x1bf   :  { %v769_v3 = vadd.f32 %v2344_v10, %v768_v0  ;;  %v965_v12 = vpack.c.bf16 %v777_v60, %v774_v62 }
 0x1c0   :  { %v1722_v4 = vpop.f32.mrf.mxu1 }
 0x1c1   :  { %v964_v5 = vpack.c.bf16 %v769_v3, %v766_v1  ;;  %v997_v61 = vmax.bf16 %v1867_v59, %v965_v12  ;;  %v790_v11 = vadd.f32 %v1722_v4, %v2344_v10 }
 0x1c2   :  { %v781_v8 = vpop.f32.mrf.mxu1 }
 0x1c3   :  { %v996_v20 = vmax.bf16 %v1867_v59, %v964_v5  ;;  %v782_v44 = vadd.f32 %v2344_v10, %v781_v8 }
 0x1c4   :  { %v1723_v51 = vpop.f32.mrf.mxu1 }
 0x1c5   :  { %v793_v9 = vadd.f32 %v1723_v51, %v2344_v10  ;;  %1796 = vmatprep.mubr.bf16.mxu0 %v996_v20 }
 0x1c6   :  { %v784_v13 = vpop.f32.mrf.mxu1  ;;  %1797 = vmatmul.mubr.bf16.gmra.mxu0 %v997_v61 }
 0x1c7   :  { %v785_v14 = vadd.f32 %v2344_v10, %v784_v13  ;;  %v967_v16 = vpack.c.bf16 %v793_v9, %v790_v11 }
 0x1c8   :  { %v1726_v30 = vpop.f32.mrf.mxu1 }
 0x1c9   :  { %v966_v18 = vpack.c.bf16 %v785_v14, %v782_v44  ;;  %v999_v19 = vmax.bf16 %v1867_v59, %v967_v16  ;;  %v806_v22 = vadd.f32 %v1726_v30, %v2344_v10 }
 0x1ca   :  { %v797_v45 = vpop.f32.mrf.mxu1 }
 0x1cb   :  { %v998_v7 = vmax.bf16 %v1867_v59, %v966_v18  ;;  %v798_v23 = vadd.f32 %v2344_v10, %v797_v45 }
 0x1cc   :  { %v1727_v15 = vpop.f32.mrf.mxu1 }
 0x1cd   :  { %v809_v21 = vadd.f32 %v1727_v15, %v2344_v10  ;;  %1800 = vmatprep.mubr.bf16.mxu0 %v998_v7 }
 0x1ce   :  { %v800_v63 = vpop.f32.mrf.mxu1  ;;  %1801 = vmatmul.mubr.bf16.gmra.mxu0 %v999_v19 }
 0x1cf   :  { %v801_v26 = vadd.f32 %v2344_v10, %v800_v63  ;;  %v969_v17 = vpack.c.bf16 %v809_v21, %v806_v22 }
 0x1d0   :  { %v1730_v25 = vpop.f32.mrf.mxu1 }
 0x1d1   :  { %v968_v36 = vpack.c.bf16 %v801_v26, %v798_v23  ;;  %v1001_v31 = vmax.bf16 %v1867_v59, %v969_v17  ;;  %v822_v33 = vadd.f32 %v1730_v25, %v2344_v10 }
 0x1d2   :  { %v813_v27 = vpop.f32.mrf.mxu1 }
 0x1d3   :  { %v1000_v28 = vmax.bf16 %v1867_v59, %v968_v36  ;;  %v814_v34 = vadd.f32 %v2344_v10, %v813_v27 }
 0x1d4   :  { %v1731_v29 = vpop.f32.mrf.mxu1 }
 0x1d5   :  { %v825_v32 = vadd.f32 %v1731_v29, %v2344_v10  ;;  %1804 = vmatprep.mubr.bf16.mxu0 %v1000_v28 }
 0x1d6   :  { %v816_v35 = vpop.f32.mrf.mxu1  ;;  %1805 = vmatmul.mubr.bf16.gmra.mxu0 %v1001_v31 }
 0x1d7   :  { %v817_v37 = vadd.f32 %v2344_v10, %v816_v35  ;;  %v971_v38 = vpack.c.bf16 %v825_v32, %v822_v33 }
 0x1d8   :  { %v1734_v52 = vpop.f32.mrf.mxu1 }
 0x1d9   :  { %v970_v6 = vpack.c.bf16 %v817_v37, %v814_v34  ;;  %v1003_v42 = vmax.bf16 %v1867_v59, %v971_v38  ;;  %v838_v47 = vadd.f32 %v1734_v52, %v2344_v10 }
 0x1da   :  { %v829_v39 = vpop.f32.mrf.mxu1 }
 0x1db   :  { %v1002_v40 = vmax.bf16 %v1867_v59, %v970_v6  ;;  %v830_v49 = vadd.f32 %v2344_v10, %v829_v39 }
 0x1dc   :  { %v1735_v41 = vpop.f32.mrf.mxu1 }
 0x1dd   :  { %v841_v46 = vadd.f32 %v1735_v41, %v2344_v10  ;;  %1808 = vmatprep.mubr.bf16.mxu0 %v1002_v40 }
 0x1de   :  { %v832_v48 = vpop.f32.mrf.mxu1  ;;  %1809 = vmatmul.mubr.bf16.gmra.mxu0 %v1003_v42 }
 0x1df   :  { %v833_v57 = vadd.f32 %v2344_v10, %v832_v48  ;;  %v973_v24 = vpack.c.bf16 %v841_v46, %v838_v47 }
 0x1e0   :  { %v1738_v43 = vpop.f32.mrf.mxu1 }
 0x1e1   :  { %v972_v50 = vpack.c.bf16 %v833_v57, %v830_v49  ;;  %v1005_v55 = vmax.bf16 %v1867_v59, %v973_v24  ;;  %v854_v58 = vadd.f32 %v1738_v43, %v2344_v10 }
 0x1e2   :  { %v845_v53 = vpop.f32.mrf.mxu1 }
 0x1e3   :  { %v1004_v54 = vmax.bf16 %v1867_v59, %v972_v50  ;;  %v846_v62 = vadd.f32 %v2344_v10, %v845_v53 }
 0x1e4   :  { %v1739_v2 = vpop.f32.mrf.mxu1 }
 0x1e5   :  { %v857_v56 = vadd.f32 %v1739_v2, %v2344_v10  ;;  %1812 = vmatprep.mubr.bf16.mxu0 %v1004_v54 }
 0x1e6   :  { %v848_v60 = vpop.f32.mrf.mxu1  ;;  %1813 = vmatmul.mubr.bf16.gmra.mxu0 %v1005_v55 }
 0x1e7   :  { %v849_v0 = vadd.f32 %v2344_v10, %v848_v60  ;;  %v975_v1 = vpack.c.bf16 %v857_v56, %v854_v58 }
 0x1e8   :  { %v1742_v3 = vpop.f32.mrf.mxu1 }
 0x1e9   :  { %v974_v12 = vpack.c.bf16 %v849_v0, %v846_v62  ;;  %v1007_v20 = vmax.bf16 %v1867_v59, %v975_v1  ;;  %v870_v61 = vadd.f32 %v1742_v3, %v2344_v10 }
 0x1ea   :  { %v861_v4 = vpop.f32.mrf.mxu1 }
 0x1eb   :  { %v1006_v5 = vmax.bf16 %v1867_v59, %v974_v12  ;;  %v862_v11 = vadd.f32 %v2344_v10, %v861_v4 }
 0x1ec   :  { %v1743_v8 = vpop.f32.mrf.mxu1 }
 0x1ed   :  { %v873_v51 = vadd.f32 %v1743_v8, %v2344_v10  ;;  %1816 = vmatprep.mubr.bf16.mxu0 %v1006_v5 }
 0x1ee   :  { %v864_v9 = vpop.f32.mrf.mxu1  ;;  %1817 = vmatmul.mubr.bf16.gmra.mxu0 %v1007_v20 }
 0x1ef   :  { %v865_v13 = vadd.f32 %v2344_v10, %v864_v9  ;;  %v977_v44 = vpack.c.bf16 %v873_v51, %v870_v61 }
 0x1f0   :  { %v1746_v14 = vpop.f32.mrf.mxu1 }
 0x1f1   :  { %v976_v16 = vpack.c.bf16 %v865_v13, %v862_v11  ;;  %v1009_v7 = vmax.bf16 %v1867_v59, %v977_v44  ;;  %v886_v19 = vadd.f32 %v1746_v14, %v2344_v10 }
 0x1f2   :  { %v877_v30 = vpop.f32.mrf.mxu1 }
 0x1f3   :  { %v1008_v18 = vmax.bf16 %v1867_v59, %v976_v16  ;;  %v878_v22 = vadd.f32 %v2344_v10, %v877_v30  ;;  %v2445_v16 = vld [vmem:[%s2773_s6] ss:$0 sm:$0xff] }
 0x1f4   :  { %v1747_v45 = vpop.f32.mrf.mxu1 }
 0x1f5   :  { %v889_v15 = vadd.f32 %v1747_v45, %v2344_v10  ;;  %1820 = vmatprep.mubr.bf16.mxu0 %v1008_v18 }
 0x1f6   :  { %v880_v21 = vpop.f32.mrf.mxu1  ;;  %1821 = vmatmul.mubr.bf16.gmra.mxu0 %v1009_v7 }
 0x1f7   :  { %v881_v63 = vadd.f32 %v2344_v10, %v880_v21  ;;  %v979_v23 = vpack.c.bf16 %v889_v15, %v886_v19 }
 0x1f8   :  { %v1750_v26 = vpop.f32.mrf.mxu1 }
 0x1f9   :  { %v978_v17 = vpack.c.bf16 %v881_v63, %v878_v22  ;;  %v1011_v28 = vmax.bf16 %v1867_v59, %v979_v23  ;;  %v902_v31 = vadd.f32 %v1750_v26, %v2344_v10 }
 0x1fa   :  { %v893_v25 = vpop.f32.mrf.mxu1 }
 0x1fb   :  { %v1010_v36 = vmax.bf16 %v1867_v59, %v978_v17  ;;  %v894_v33 = vadd.f32 %v2344_v10, %v893_v25 }
 0x1fc   :  { %v1751_v27 = vpop.f32.mrf.mxu1 }
 0x1fd   :  { %v905_v29 = vadd.f32 %v1751_v27, %v2344_v10  ;;  %1824 = vmatprep.mubr.bf16.mxu0 %v1010_v36 }
 0x1fe   :  { %v896_v32 = vpop.f32.mrf.mxu1  ;;  %1825 = vmatmul.mubr.bf16.gmra.mxu0 %v1011_v28 }
 0x1ff   :  { %v897_v35 = vadd.f32 %v2344_v10, %v896_v32  ;;  %v981_v34 = vpack.c.bf16 %v905_v29, %v902_v31 }
 0x200   :  { %v1754_v37 = vpop.f32.mrf.mxu1 }
 0x201   :  { %v980_v38 = vpack.c.bf16 %v897_v35, %v894_v33  ;;  %v1013_v40 = vmax.bf16 %v1867_v59, %v981_v34  ;;  %v918_v42 = vadd.f32 %v1754_v37, %v2344_v10 }
 0x202   :  { %v909_v52 = vpop.f32.mrf.mxu1 }
 0x203   :  { %v1012_v6 = vmax.bf16 %v1867_v59, %v980_v38  ;;  %v910_v47 = vadd.f32 %v2344_v10, %v909_v52 }
 0x204   :  { %v1755_v39 = vpop.f32.mrf.mxu1 }
 0x205   :  { %v921_v41 = vadd.f32 %v1755_v39, %v2344_v10  ;;  %1828 = vmatprep.mubr.bf16.mxu0 %v1012_v6 }
 0x206   :  { %v912_v46 = vpop.f32.mrf.mxu1  ;;  %1829 = vmatmul.mubr.bf16.gmra.mxu0 %v1013_v40 }
 0x207   :  { %v913_v48 = vadd.f32 %v2344_v10, %v912_v46  ;;  %v983_v49 = vpack.c.bf16 %v921_v41, %v918_v42 }
 0x208   :  { %v1758_v57 = vpop.f32.mrf.mxu1 }
 0x209   :  { %v982_v24 = vpack.c.bf16 %v913_v48, %v910_v47  ;;  %v1015_v54 = vmax.bf16 %v1867_v59, %v983_v49  ;;  %v934_v55 = vadd.f32 %v1758_v57, %v2344_v10 }
 0x20a   :  { %v925_v43 = vpop.f32.mrf.mxu1 }
 0x20b   :  { %v1014_v50 = vmax.bf16 %v1867_v59, %v982_v24  ;;  %v926_v58 = vadd.f32 %v2344_v10, %v925_v43 }
 0x20c   :  { %v1759_v53 = vpop.f32.mrf.mxu1 }
 0x20d   :  { %v937_v2 = vadd.f32 %v1759_v53, %v2344_v10  ;;  %1832 = vmatprep.mubr.bf16.mxu0 %v1014_v50 }
 0x20e   :  { %v928_v56 = vpop.f32.mrf.mxu1  ;;  %1833 = vmatmul.mubr.bf16.gmra.mxu0 %v1015_v54 }
 0x20f   :  { %v929_v60 = vadd.f32 %v2344_v10, %v928_v56  ;;  %v985_v62 = vpack.c.bf16 %v937_v2, %v934_v55 }
 0x210   :  { %v1762_v0 = vpop.f32.mrf.mxu1 }
 0x211   :  { %v984_v1 = vpack.c.bf16 %v929_v60, %v926_v58  ;;  %v1017_v5 = vmax.bf16 %v1867_v59, %v985_v62  ;;  %v950_v20 = vadd.f32 %v1762_v0, %v2344_v10 }
 0x212   :  { %v941_v3 = vpop.f32.mrf.mxu1 }
 0x213   :  { %v1016_v12 = vmax.bf16 %v1867_v59, %v984_v1  ;;  %v942_v61 = vadd.f32 %v2344_v10, %v941_v3 }
 0x214   :  { %v1763_v4 = vpop.f32.mrf.mxu1 }
 0x215   :  { %v953_v8 = vadd.f32 %v1763_v4, %v2344_v10  ;;  %1836 = vmatprep.mubr.bf16.mxu0 %v1016_v12 }
 0x216   :  { %v944_v51 = vpop.f32.mrf.mxu1  ;;  %1837 = vmatmul.mubr.bf16.gmra.mxu0 %v1017_v5 }
 0x217   :  { %v945_v9 = vadd.f32 %v2344_v10, %v944_v51  ;;  %v987_v11 = vpack.c.bf16 %v953_v8, %v950_v20 }
 0x219   :  { %v986_v13 = vpack.c.bf16 %v945_v9, %v942_v61  ;;  %v1019_v14 = vmax.bf16 %v1867_v59, %v987_v11 }
 0x21b   :  { %v1018_v44 = vmax.bf16 %v1867_v59, %v986_v13 }
 0x21d   :  { %1840 = vmatprep.mubr.bf16.mxu0 %v1018_v44 }
 0x21e   :  { %1841 = vmatmul.mubr.bf16.gmra.mxu0 %v1019_v14 }
 0x266   :  { %v1782_v30 = vpop.f32.mrf.mxu0 }
 0x267   :  { %v1134_v18 = vadd.f32 %v1782_v30, %v2445_v16 }
 0x268   :  { %v1125_v45 = vpop.f32.mrf.mxu0 }
 0x269   :  { %1383 = vst.msk [vmem:[%s2774_s7 + $0x10] sm:$0xff] %vm1380_vm1, %v1134_v18  ;;  %v1126_v10 = vadd.f32 %v2445_v16, %v1125_v45 }
 0x26a   :  { %v1783_v59 = vpop.f32.mrf.mxu0 }
 0x26b   :  { %1381 = vst.msk [vmem:[%s2774_s7] sm:$0xff] %vm1380_vm1, %v1126_v10  ;;  %v1137_v7 = vadd.f32 %v1783_v59, %v2445_v16 }
 0x26c   :  { %v1128_v15 = vpop.f32.mrf.mxu0 }
 0x26d   :  { %1384 = vst.msk [vmem:[%s2774_s7 + $0x18] sm:$0xff] %vm1380_vm1, %v1137_v7  ;;  %v1129_v19 = vadd.f32 %v2445_v16, %v1128_v15 }
 0x26e   :  { %v1786_v21 = vpop.f32.mrf.mxu0 }
 0x26f   :  { %1382 = vst.msk [vmem:[%s2774_s7 + $0x8] sm:$0xff] %vm1380_vm1, %v1129_v19  ;;  %v1150_v22 = vadd.f32 %v1786_v21, %v2445_v16 }
 0x270   :  { %v1141_v63 = vpop.f32.mrf.mxu0 }
 0x271   :  { %1387 = vst.msk [vmem:[%s2774_s7 + $0x30] sm:$0xff] %vm1380_vm1, %v1150_v22  ;;  %v1142_v23 = vadd.f32 %v2445_v16, %v1141_v63 }
 0x272   :  { %v1787_v26 = vpop.f32.mrf.mxu0 }
 0x273   :  { %1385 = vst.msk [vmem:[%s2774_s7 + $0x20] sm:$0xff] %vm1380_vm1, %v1142_v23  ;;  %v1153_v17 = vadd.f32 %v1787_v26, %v2445_v16 }
 0x274   :  { %v1144_v25 = vpop.f32.mrf.mxu0 }
 0x275   :  { %1388 = vst.msk [vmem:[%s2774_s7 + $0x38] sm:$0xff] %vm1380_vm1, %v1153_v17  ;;  %v1145_v36 = vadd.f32 %v2445_v16, %v1144_v25 }
 0x276   :  { %v1790_v27 = vpop.f32.mrf.mxu0 }
 0x277   :  { %1386 = vst.msk [vmem:[%s2774_s7 + $0x28] sm:$0xff] %vm1380_vm1, %v1145_v36  ;;  %v1166_v28 = vadd.f32 %v1790_v27, %v2445_v16 }
 0x278   :  { %v1157_v29 = vpop.f32.mrf.mxu0 }
 0x279   :  { %1391 = vst.msk [vmem:[%s2774_s7 + $0x50] sm:$0xff] %vm1380_vm1, %v1166_v28  ;;  %v1158_v31 = vadd.f32 %v2445_v16, %v1157_v29 }
 0x27a   :  { %v1791_v32 = vpop.f32.mrf.mxu0 }
 0x27b   :  { %1389 = vst.msk [vmem:[%s2774_s7 + $0x40] sm:$0xff] %vm1380_vm1, %v1158_v31  ;;  %v1169_v33 = vadd.f32 %v1791_v32, %v2445_v16 }
 0x27c   :  { %v1160_v35 = vpop.f32.mrf.mxu0 }
 0x27d   :  { %1392 = vst.msk [vmem:[%s2774_s7 + $0x58] sm:$0xff] %vm1380_vm1, %v1169_v33  ;;  %v1161_v34 = vadd.f32 %v2445_v16, %v1160_v35 }
 0x27e   :  { %v1794_v37 = vpop.f32.mrf.mxu0 }
 0x27f   :  { %1390 = vst.msk [vmem:[%s2774_s7 + $0x48] sm:$0xff] %vm1380_vm1, %v1161_v34  ;;  %v1182_v38 = vadd.f32 %v1794_v37, %v2445_v16 }
 0x280   :  { %v1173_v52 = vpop.f32.mrf.mxu0 }
 0x281   :  { %1395 = vst.msk [vmem:[%s2774_s7 + $0x70] sm:$0xff] %vm1380_vm1, %v1182_v38  ;;  %v1174_v6 = vadd.f32 %v2445_v16, %v1173_v52 }
 0x282   :  { %v1795_v39 = vpop.f32.mrf.mxu0 }
 0x283   :  { %1393 = vst.msk [vmem:[%s2774_s7 + $0x60] sm:$0xff] %vm1380_vm1, %v1174_v6  ;;  %v1185_v40 = vadd.f32 %v1795_v39, %v2445_v16 }
 0x284   :  { %v1176_v41 = vpop.f32.mrf.mxu0 }
 0x285   :  { %1396 = vst.msk [vmem:[%s2774_s7 + $0x78] sm:$0xff] %vm1380_vm1, %v1185_v40  ;;  %v1177_v42 = vadd.f32 %v2445_v16, %v1176_v41 }
 0x286   :  { %v1798_v46 = vpop.f32.mrf.mxu0 }
 0x287   :  { %1394 = vst.msk [vmem:[%s2774_s7 + $0x68] sm:$0xff] %vm1380_vm1, %v1177_v42  ;;  %v1198_v47 = vadd.f32 %v1798_v46, %v2445_v16 }
 0x288   :  { %v1189_v48 = vpop.f32.mrf.mxu0 }
 0x289   :  { %1399 = vst.msk [vmem:[%s2774_s7 + $0x90] sm:$0xff] %vm1380_vm1, %v1198_v47  ;;  %v1190_v49 = vadd.f32 %v2445_v16, %v1189_v48 }
 0x28a   :  { %v1799_v57 = vpop.f32.mrf.mxu0 }
 0x28b   :  { %1397 = vst.msk [vmem:[%s2774_s7 + $0x80] sm:$0xff] %vm1380_vm1, %v1190_v49  ;;  %v1201_v24 = vadd.f32 %v1799_v57, %v2445_v16 }
 0x28c   :  { %v1192_v43 = vpop.f32.mrf.mxu0 }
 0x28d   :  { %1400 = vst.msk [vmem:[%s2774_s7 + $0x98] sm:$0xff] %vm1380_vm1, %v1201_v24  ;;  %v1193_v50 = vadd.f32 %v2445_v16, %v1192_v43 }
 0x28e   :  { %v1802_v53 = vpop.f32.mrf.mxu0 }
 0x28f   :  { %1398 = vst.msk [vmem:[%s2774_s7 + $0x88] sm:$0xff] %vm1380_vm1, %v1193_v50  ;;  %v1214_v54 = vadd.f32 %v1802_v53, %v2445_v16 }
 0x290   :  { %v1205_v2 = vpop.f32.mrf.mxu0 }
 0x291   :  { %1403 = vst.msk [vmem:[%s2774_s7 + $0xb0] sm:$0xff] %vm1380_vm1, %v1214_v54  ;;  %v1206_v55 = vadd.f32 %v2445_v16, %v1205_v2 }
 0x292   :  { %v1803_v56 = vpop.f32.mrf.mxu0 }
 0x293   :  { %1401 = vst.msk [vmem:[%s2774_s7 + $0xa0] sm:$0xff] %vm1380_vm1, %v1206_v55  ;;  %v1217_v58 = vadd.f32 %v1803_v56, %v2445_v16 }
 0x294   :  { %v1208_v60 = vpop.f32.mrf.mxu0 }
 0x295   :  { %1404 = vst.msk [vmem:[%s2774_s7 + $0xb8] sm:$0xff] %vm1380_vm1, %v1217_v58  ;;  %v1209_v62 = vadd.f32 %v2445_v16, %v1208_v60 }
 0x296   :  { %v1806_v0 = vpop.f32.mrf.mxu0 }
 0x297   :  { %1402 = vst.msk [vmem:[%s2774_s7 + $0xa8] sm:$0xff] %vm1380_vm1, %v1209_v62  ;;  %v1230_v1 = vadd.f32 %v1806_v0, %v2445_v16 }
 0x298   :  { %v1221_v3 = vpop.f32.mrf.mxu0 }
 0x299   :  { %1407 = vst.msk [vmem:[%s2774_s7 + $0xd0] sm:$0xff] %vm1380_vm1, %v1230_v1  ;;  %v1222_v12 = vadd.f32 %v2445_v16, %v1221_v3 }
 0x29a   :  { %v1807_v4 = vpop.f32.mrf.mxu0 }
 0x29b   :  { %1405 = vst.msk [vmem:[%s2774_s7 + $0xc0] sm:$0xff] %vm1380_vm1, %v1222_v12  ;;  %v1233_v5 = vadd.f32 %v1807_v4, %v2445_v16 }
 0x29c   :  { %v1224_v8 = vpop.f32.mrf.mxu0 }
 0x29d   :  { %1408 = vst.msk [vmem:[%s2774_s7 + $0xd8] sm:$0xff] %vm1380_vm1, %v1233_v5  ;;  %v1225_v20 = vadd.f32 %v2445_v16, %v1224_v8 }
 0x29e   :  { %v1810_v51 = vpop.f32.mrf.mxu0 }
 0x29f   :  { %1406 = vst.msk [vmem:[%s2774_s7 + $0xc8] sm:$0xff] %vm1380_vm1, %v1225_v20  ;;  %v1246_v61 = vadd.f32 %v1810_v51, %v2445_v16 }
 0x2a0   :  { %v1237_v9 = vpop.f32.mrf.mxu0 }
 0x2a1   :  { %1411 = vst.msk [vmem:[%s2774_s7 + $0xf0] sm:$0xff] %vm1380_vm1, %v1246_v61  ;;  %v1238_v11 = vadd.f32 %v2445_v16, %v1237_v9 }
 0x2a2   :  { %v1811_v13 = vpop.f32.mrf.mxu0 }
 0x2a3   :  { %1409 = vst.msk [vmem:[%s2774_s7 + $0xe0] sm:$0xff] %vm1380_vm1, %v1238_v11  ;;  %v1249_v44 = vadd.f32 %v1811_v13, %v2445_v16 }
 0x2a4   :  { %v1240_v14 = vpop.f32.mrf.mxu0 }
 0x2a5   :  { %1412 = vst.msk [vmem:[%s2774_s7 + $0xf8] sm:$0xff] %vm1380_vm1, %v1249_v44  ;;  %v1241_v30 = vadd.f32 %v2445_v16, %v1240_v14 }
 0x2a6   :  { %v1814_v18 = vpop.f32.mrf.mxu0 }
 0x2a7   :  { %1410 = vst.msk [vmem:[%s2774_s7 + $0xe8] sm:$0xff] %vm1380_vm1, %v1241_v30  ;;  %v1262_v45 = vadd.f32 %v1814_v18, %v2445_v16 }
 0x2a8   :  { %v1253_v10 = vpop.f32.mrf.mxu0 }
 0x2a9   :  { %1415 = vst.msk [vmem:[%s2774_s7 + $0x110] sm:$0xff] %vm1380_vm1, %v1262_v45  ;;  %v1254_v59 = vadd.f32 %v2445_v16, %v1253_v10 }
 0x2aa   :  { %v1815_v7 = vpop.f32.mrf.mxu0 }
 0x2ab   :  { %1413 = vst.msk [vmem:[%s2774_s7 + $0x100] sm:$0xff] %vm1380_vm1, %v1254_v59  ;;  %v1265_v15 = vadd.f32 %v1815_v7, %v2445_v16 }
 0x2ac   :  { %v1256_v19 = vpop.f32.mrf.mxu0 }
 0x2ad   :  { %1416 = vst.msk [vmem:[%s2774_s7 + $0x118] sm:$0xff] %vm1380_vm1, %v1265_v15  ;;  %v1257_v21 = vadd.f32 %v2445_v16, %v1256_v19 }
 0x2ae   :  { %v1818_v22 = vpop.f32.mrf.mxu0 }
 0x2af   :  { %1414 = vst.msk [vmem:[%s2774_s7 + $0x108] sm:$0xff] %vm1380_vm1, %v1257_v21  ;;  %v1278_v63 = vadd.f32 %v1818_v22, %v2445_v16 }
 0x2b0   :  { %v1269_v23 = vpop.f32.mrf.mxu0 }
 0x2b1   :  { %1419 = vst.msk [vmem:[%s2774_s7 + $0x130] sm:$0xff] %vm1380_vm1, %v1278_v63  ;;  %v1270_v26 = vadd.f32 %v2445_v16, %v1269_v23 }
 0x2b2   :  { %v1819_v17 = vpop.f32.mrf.mxu0 }
 0x2b3   :  { %1417 = vst.msk [vmem:[%s2774_s7 + $0x120] sm:$0xff] %vm1380_vm1, %v1270_v26  ;;  %v1281_v25 = vadd.f32 %v1819_v17, %v2445_v16 }
 0x2b4   :  { %v1272_v36 = vpop.f32.mrf.mxu0 }
 0x2b5   :  { %1420 = vst.msk [vmem:[%s2774_s7 + $0x138] sm:$0xff] %vm1380_vm1, %v1281_v25  ;;  %v1273_v27 = vadd.f32 %v2445_v16, %v1272_v36 }
 0x2b6   :  { %v1822_v28 = vpop.f32.mrf.mxu0 }
 0x2b7   :  { %1418 = vst.msk [vmem:[%s2774_s7 + $0x128] sm:$0xff] %vm1380_vm1, %v1273_v27  ;;  %v1294_v29 = vadd.f32 %v1822_v28, %v2445_v16 }
 0x2b8   :  { %v1285_v31 = vpop.f32.mrf.mxu0 }
 0x2b9   :  { %1423 = vst.msk [vmem:[%s2774_s7 + $0x150] sm:$0xff] %vm1380_vm1, %v1294_v29  ;;  %v1286_v32 = vadd.f32 %v2445_v16, %v1285_v31 }
 0x2ba   :  { %v1823_v33 = vpop.f32.mrf.mxu0 }
 0x2bb   :  { %1421 = vst.msk [vmem:[%s2774_s7 + $0x140] sm:$0xff] %vm1380_vm1, %v1286_v32  ;;  %v1297_v35 = vadd.f32 %v1823_v33, %v2445_v16 }
 0x2bc   :  { %v1288_v34 = vpop.f32.mrf.mxu0 }
 0x2bd   :  { %1424 = vst.msk [vmem:[%s2774_s7 + $0x158] sm:$0xff] %vm1380_vm1, %v1297_v35  ;;  %v1289_v37 = vadd.f32 %v2445_v16, %v1288_v34 }
 0x2be   :  { %v1826_v38 = vpop.f32.mrf.mxu0 }
 0x2bf   :  { %1422 = vst.msk [vmem:[%s2774_s7 + $0x148] sm:$0xff] %vm1380_vm1, %v1289_v37  ;;  %v1310_v52 = vadd.f32 %v1826_v38, %v2445_v16 }
 0x2c0   :  { %v1301_v6 = vpop.f32.mrf.mxu0 }
 0x2c1   :  { %1427 = vst.msk [vmem:[%s2774_s7 + $0x170] sm:$0xff] %vm1380_vm1, %v1310_v52  ;;  %v1302_v39 = vadd.f32 %v2445_v16, %v1301_v6 }
 0x2c2   :  { %v1827_v40 = vpop.f32.mrf.mxu0 }
 0x2c3   :  { %1425 = vst.msk [vmem:[%s2774_s7 + $0x160] sm:$0xff] %vm1380_vm1, %v1302_v39  ;;  %v1313_v41 = vadd.f32 %v1827_v40, %v2445_v16 }
 0x2c4   :  { %v1304_v42 = vpop.f32.mrf.mxu0 }
 0x2c5   :  { %1428 = vst.msk [vmem:[%s2774_s7 + $0x178] sm:$0xff] %vm1380_vm1, %v1313_v41  ;;  %v1305_v46 = vadd.f32 %v2445_v16, %v1304_v42 }
 0x2c6   :  { %v1830_v47 = vpop.f32.mrf.mxu0 }
 0x2c7   :  { %1426 = vst.msk [vmem:[%s2774_s7 + $0x168] sm:$0xff] %vm1380_vm1, %v1305_v46  ;;  %v1326_v48 = vadd.f32 %v1830_v47, %v2445_v16 }
 0x2c8   :  { %v1317_v49 = vpop.f32.mrf.mxu0 }
 0x2c9   :  { %1431 = vst.msk [vmem:[%s2774_s7 + $0x190] sm:$0xff] %vm1380_vm1, %v1326_v48  ;;  %v1318_v57 = vadd.f32 %v2445_v16, %v1317_v49 }
 0x2ca   :  { %v1831_v24 = vpop.f32.mrf.mxu0 }
 0x2cb   :  { %1429 = vst.msk [vmem:[%s2774_s7 + $0x180] sm:$0xff] %vm1380_vm1, %v1318_v57  ;;  %v1329_v43 = vadd.f32 %v1831_v24, %v2445_v16 }
 0x2cc   :  { %v1320_v50 = vpop.f32.mrf.mxu0 }
 0x2cd   :  { %1432 = vst.msk [vmem:[%s2774_s7 + $0x198] sm:$0xff] %vm1380_vm1, %v1329_v43  ;;  %v1321_v53 = vadd.f32 %v2445_v16, %v1320_v50 }
 0x2ce   :  { %v1834_v54 = vpop.f32.mrf.mxu0 }
 0x2cf   :  { %1430 = vst.msk [vmem:[%s2774_s7 + $0x188] sm:$0xff] %vm1380_vm1, %v1321_v53  ;;  %v1342_v2 = vadd.f32 %v1834_v54, %v2445_v16 }
 0x2d0   :  { %v1333_v55 = vpop.f32.mrf.mxu0 }
 0x2d1   :  { %1435 = vst.msk [vmem:[%s2774_s7 + $0x1b0] sm:$0xff] %vm1380_vm1, %v1342_v2  ;;  %v1334_v56 = vadd.f32 %v2445_v16, %v1333_v55 }
 0x2d2   :  { %v1835_v58 = vpop.f32.mrf.mxu0 }
 0x2d3   :  { %1433 = vst.msk [vmem:[%s2774_s7 + $0x1a0] sm:$0xff] %vm1380_vm1, %v1334_v56  ;;  %v1345_v60 = vadd.f32 %v1835_v58, %v2445_v16 }
 0x2d4   :  { %v1336_v62 = vpop.f32.mrf.mxu0 }
 0x2d5   :  { %1436 = vst.msk [vmem:[%s2774_s7 + $0x1b8] sm:$0xff] %vm1380_vm1, %v1345_v60  ;;  %v1337_v0 = vadd.f32 %v2445_v16, %v1336_v62 }
 0x2d6   :  { %v1838_v1 = vpop.f32.mrf.mxu0 }
 0x2d7   :  { %1434 = vst.msk [vmem:[%s2774_s7 + $0x1a8] sm:$0xff] %vm1380_vm1, %v1337_v0  ;;  %v1358_v3 = vadd.f32 %v1838_v1, %v2445_v16 }
 0x2d8   :  { %v1349_v12 = vpop.f32.mrf.mxu0 }
 0x2d9   :  { %1439 = vst.msk [vmem:[%s2774_s7 + $0x1d0] sm:$0xff] %vm1380_vm1, %v1358_v3  ;;  %v1350_v4 = vadd.f32 %v2445_v16, %v1349_v12 }
 0x2da   :  { %v1839_v5 = vpop.f32.mrf.mxu0 }
 0x2db   :  { %1437 = vst.msk [vmem:[%s2774_s7 + $0x1c0] sm:$0xff] %vm1380_vm1, %v1350_v4  ;;  %v1361_v8 = vadd.f32 %v1839_v5, %v2445_v16 }
 0x2dc   :  { %v1352_v20 = vpop.f32.mrf.mxu0 }
 0x2dd   :  { %1440 = vst.msk [vmem:[%s2774_s7 + $0x1d8] sm:$0xff] %vm1380_vm1, %v1361_v8  ;;  %v1353_v51 = vadd.f32 %v2445_v16, %v1352_v20 }
 0x2de   :  { %v1842_v61 = vpop.f32.mrf.mxu0 }
 0x2df   :  { %1438 = vst.msk [vmem:[%s2774_s7 + $0x1c8] sm:$0xff] %vm1380_vm1, %v1353_v51  ;;  %v1374_v9 = vadd.f32 %v1842_v61, %v2445_v16 }
 0x2e0   :  { %v1365_v11 = vpop.f32.mrf.mxu0 }
 0x2e1   :  { %1443 = vst.msk [vmem:[%s2774_s7 + $0x1f0] sm:$0xff] %vm1380_vm1, %v1374_v9  ;;  %v1366_v13 = vadd.f32 %v2445_v16, %v1365_v11 }
 0x2e2   :  { %v1843_v44 = vpop.f32.mrf.mxu0 }
 0x2e3   :  { %1441 = vst.msk [vmem:[%s2774_s7 + $0x1e0] sm:$0xff] %vm1380_vm1, %v1366_v13  ;;  %v1377_v14 = vadd.f32 %v1843_v44, %v2445_v16 }
 0x2e4   :  { %v1368_v30 = vpop.f32.mrf.mxu0 }
 0x2e5   :  { %1444 = vst.msk [vmem:[%s2774_s7 + $0x1f8] sm:$0xff] %vm1380_vm1, %v1377_v14  ;;  %v1369_v18 = vadd.f32 %v2445_v16, %v1368_v30 }
 0x2e7   :  { %1442 = vst.msk [vmem:[%s2774_s7 + $0x1e8] sm:$0xff] %vm1380_vm1, %v1369_v18 }

</bundles_post_ra>
